<compile_context>
chip_gen: v7x
topology: tpu7x:2x2x1
jax: 0.10.0
libtpu: 0.0.40
codegen_flags: <defaults>
</compile_context>

<pallas_src>
import functools

import jax
import jax.numpy as jnp
from jax import lax
from jax.experimental import pallas as pl
from jax.experimental.pallas import tpu as pltpu


# ------------------------- fused GAT forward kernel -------------------------
def _gat_fused_kernel(
    x_ref, adj_ref,
    w1_ref, as1_ref, ad1_ref, b1_ref,
    w2_ref, as2_ref, ad2_ref, b2_ref,
    w3_ref, as3_ref, ad3_ref, b3_ref,
    pool_ref, lw1_ref, lb1_ref, lw2_ref, lb2_ref,
    o_ref,
    *, negative_slope,
):
    adj = adj_ref[...]                                             # (N, N) f32
    # Additive edge mask, computed once and reused by all 3 layers.
    mask_bias = jnp.where(adj > 0, 0.0, -1e9).astype(jnp.float32)  # (N, N)

    def gat_layer(x_bf16, w_ref, asrc_ref, adst_ref, b_ref, apply_relu):
        # Linear transform on the MXU: bf16 operands, f32 accumulation.
        h = jnp.dot(x_bf16, w_ref[...],
                    preferred_element_type=jnp.float32)            # (N, Fout)

        att_src = asrc_ref[...]                                    # (1, Fout)
        att_dst = adst_ref[...]                                    # (1, Fout)

        # destination score d[i] = <h_i, att_dst>
        d = jnp.sum(h * att_dst, axis=1, keepdims=True)            # (N, 1)
        # source score s[0, j] = <h_j, att_src>  (skinny contraction -> (1,N))
        s = lax.dot_general(att_src, h, (((1,), (1,)), ((), ())),
                            preferred_element_type=jnp.float32)    # (1, N)

        # e[i, j] = LeakyReLU(d_i + s_j), mask non-edges once (additive bias).
        e = d + s                                                  # (N, N)
        e = jnp.where(e > 0, e, negative_slope * e)
        e = e + mask_bias

        # Masked softmax over incoming neighbours j (self-loop => denom >= 1).
        e_max = jnp.max(e, axis=1, keepdims=True)                  # (N, 1)
        p = jnp.exp(e - e_max)                                     # masked -> 0
        denom = jnp.maximum(jnp.sum(p, axis=1, keepdims=True), 1e-9)

        # Aggregate first, normalize after (folds the divide into (N, Fout)).
        agg = jnp.dot(p.astype(jnp.bfloat16), h.astype(jnp.bfloat16),
                      preferred_element_type=jnp.float32)          # (N, Fout)
        out = agg * pl.reciprocal(denom, approx=True) + b_ref[...]
        if apply_relu:
            out = jnp.maximum(out, 0.0)
        return out

    x0 = x_ref[...].astype(jnp.bfloat16)                           # (N, Fin)
    x1 = gat_layer(x0, w1_ref, as1_ref, ad1_ref, b1_ref, apply_relu=True)
    x2 = gat_layer(x1.astype(jnp.bfloat16), w2_ref, as2_ref, ad2_ref, b2_ref,
                   apply_relu=True)
    x3 = gat_layer(x2.astype(jnp.bfloat16), w3_ref, as3_ref, ad3_ref, b3_ref,
                   apply_relu=False)

    # global_add_pool as one-hot matmul: (G, N) @ (N, 128) -> (G, 128)
    pooled = jnp.dot(pool_ref[...], x3.astype(jnp.bfloat16),
                     preferred_element_type=jnp.float32)
    # 2-layer MLP head
    y = jnp.dot(pooled.astype(jnp.bfloat16), lw1_ref[...],
                preferred_element_type=jnp.float32) + lb1_ref[...]
    y = jnp.maximum(y, 0.0)
    z = jnp.dot(y.astype(jnp.bfloat16), lw2_ref[...],
                preferred_element_type=jnp.float32) + lb2_ref[...]

    # log_softmax along dim=0 (over graphs), exactly as in the PyTorch module.
    m = jnp.max(z, axis=0, keepdims=True)
    lse = jnp.log(jnp.sum(jnp.exp(z - m), axis=0, keepdims=True)) + m
    o_ref[...] = z - lse


# --------------------------------- wrapper ----------------------------------
def gat_forward(params, x, adj, pool):
    n, fin = x.shape
    g = pool.shape[0]
    w1, as1, ad1, b1 = params["conv1"]
    w2, as2, ad2, b2 = params["conv2"]
    w3, as3, ad3, b3 = params["conv3"]
    lw1, lb1 = params["lin1"]
    lw2, lb2 = params["lin2"]
    f1, f2, f3 = w1.shape[1], w2.shape[1], w3.shape[1]
    h1, c = lw1.shape[1], lw2.shape[1]

    # Cast pure-matmul operands to bf16 once (outside the kernel).
    bf = lambda a: a.astype(jnp.bfloat16)

    def full(shape):
        return pl.BlockSpec(shape, lambda i, _nd=len(shape): (0,) * _nd)

    kernel = functools.partial(_gat_fused_kernel, negative_slope=0.2)
    return pl.pallas_call(
        kernel,
        out_shape=jax.ShapeDtypeStruct((g, c), jnp.float32),
        grid=(1,),
        in_specs=[
            full((n, fin)), full((n, n)),
            full((fin, f1)), full((1, f1)), full((1, f1)), full((1, f1)),
            full((f1, f2)), full((1, f2)), full((1, f2)), full((1, f2)),
            full((f2, f3)), full((1, f3)), full((1, f3)), full((1, f3)),
            full((g, n)),
            full((f3, h1)), full((1, h1)),
            full((h1, c)), full((1, c)),
        ],
        out_specs=full((g, c)),
        compiler_params=pltpu.CompilerParams(
            dimension_semantics=("arbitrary",),
            vmem_limit_bytes=64 << 20,
        ),
    )(x, adj,
      bf(w1), as1, ad1, b1,
      bf(w2), as2, ad2, b2,
      bf(w3), as3, ad3, b3,
      bf(pool), bf(lw1), lb1, bf(lw2), lb2)


def init_params(key, num_node_features, num_classes):
    ks = jax.random.split(key, 16)

    def n(k, shape, scale=0.1):
        return (scale * jax.random.normal(k, shape)).astype(jnp.float32)

    params = {
        "conv1": (n(ks[0], (num_node_features, 32)), n(ks[1], (1, 32)),
                  n(ks[2], (1, 32)), n(ks[3], (1, 32))),
        "conv2": (n(ks[4], (32, 64)), n(ks[5], (1, 64)),
                  n(ks[6], (1, 64)), n(ks[7], (1, 64))),
        "conv3": (n(ks[8], (64, 128)), n(ks[9], (1, 128)),
                  n(ks[10], (1, 128)), n(ks[11], (1, 128))),
        "lin1": (n(ks[12], (128, 32)), n(ks[13], (1, 32))),
        "lin2": (n(ks[14], (32, num_classes)), n(ks[15], (1, num_classes))),
    }
    return params


if __name__ == "__main__":
    num_node_features = 8
    num_classes = 4
    num_nodes = 16            # 2 graphs x 8 nodes
    num_graphs = 2
    edges_per_graph = 24

    key = jax.random.PRNGKey(0)
    k_x, k_e0, k_e1, k_p = jax.random.split(key, 4)

    # node features (N, F)
    x = jax.random.normal(k_x, (num_nodes, num_node_features), dtype=jnp.float32)

    # deterministic random directed edges, confined to each graph
    src0 = jax.random.randint(k_e0, (edges_per_graph,), 0, 8)
    dst0 = jax.random.randint(jax.random.fold_in(k_e0, 1), (edges_per_graph,), 0, 8)
    src1 = jax.random.randint(k_e1, (edges_per_graph,), 8, 16)
    dst1 = jax.random.randint(jax.random.fold_in(k_e1, 1), (edges_per_graph,), 8, 16)
    src = jnp.concatenate([src0, src1])
    dst = jnp.concatenate([dst0, dst1])

    # dense adjacency: adj[dst, src] = 1, plus self-loops (GATConv default)
    adj = jnp.zeros((num_nodes, num_nodes), dtype=jnp.float32)
    adj = adj.at[dst, src].set(1.0)
    adj = adj.at[jnp.arange(num_nodes), jnp.arange(num_nodes)].set(1.0)

    # batch assignment -> one-hot pooling matrix (G, N) for global_add_pool
    batch = jnp.concatenate([jnp.zeros(8, jnp.int32), jnp.ones(8, jnp.int32)])
    pool = (batch[None, :] == jnp.arange(num_graphs)[:, None]).astype(jnp.float32)

    params = init_params(k_p, num_node_features, num_classes)

    out = jax.jit(gat_forward)(params, x, adj, pool)
    out = jax.block_until_ready(out)
    assert out.shape == (num_graphs, num_classes)
    assert bool(jnp.all(jnp.isfinite(out)))
    print("KERNEL_OK")
</pallas_src>

<mosaic_0001>
module attributes {stable_mosaic.version = 11 : i64} {
  func.func @_gat_fused_kernel(%arg0: i32, %arg1: memref<16x8xf32, #tpu.memory_space<vmem>>, %arg2: memref<16x16xf32, #tpu.memory_space<vmem>>, %arg3: memref<8x32xbf16, #tpu.memory_space<vmem>>, %arg4: memref<1x32xf32, #tpu.memory_space<vmem>>, %arg5: memref<1x32xf32, #tpu.memory_space<vmem>>, %arg6: memref<1x32xf32, #tpu.memory_space<vmem>>, %arg7: memref<32x64xbf16, #tpu.memory_space<vmem>>, %arg8: memref<1x64xf32, #tpu.memory_space<vmem>>, %arg9: memref<1x64xf32, #tpu.memory_space<vmem>>, %arg10: memref<1x64xf32, #tpu.memory_space<vmem>>, %arg11: memref<64x128xbf16, #tpu.memory_space<vmem>>, %arg12: memref<1x128xf32, #tpu.memory_space<vmem>>, %arg13: memref<1x128xf32, #tpu.memory_space<vmem>>, %arg14: memref<1x128xf32, #tpu.memory_space<vmem>>, %arg15: memref<2x16xbf16, #tpu.memory_space<vmem>>, %arg16: memref<128x32xbf16, #tpu.memory_space<vmem>>, %arg17: memref<1x32xf32, #tpu.memory_space<vmem>>, %arg18: memref<32x4xbf16, #tpu.memory_space<vmem>>, %arg19: memref<1x4xf32, #tpu.memory_space<vmem>>, %arg20: memref<2x4xf32, #tpu.memory_space<vmem>>) attributes {dimension_semantics = [#tpu.dimension_semantics<arbitrary>], iteration_bounds = array<i64: 1>, scalar_prefetch = 0 : i64, scratch_operands = 0 : i64, tpu.core_type = #tpu.core_type<tc>, window_params = [{pipeline_mode = #tpu.pipeline_mode<synchronous>, transform_indices = @transform_0, window_bounds = array<i64: 16, 8>}, {pipeline_mode = #tpu.pipeline_mode<synchronous>, transform_indices = @transform_1, window_bounds = array<i64: 16, 16>}, {pipeline_mode = #tpu.pipeline_mode<synchronous>, transform_indices = @transform_2, window_bounds = array<i64: 8, 32>}, {pipeline_mode = #tpu.pipeline_mode<synchronous>, transform_indices = @transform_3, window_bounds = array<i64: 1, 32>}, {pipeline_mode = #tpu.pipeline_mode<synchronous>, transform_indices = @transform_4, window_bounds = array<i64: 1, 32>}, {pipeline_mode = #tpu.pipeline_mode<synchronous>, transform_indices = @transform_5, window_bounds = array<i64: 1, 32>}, {pipeline_mode = #tpu.pipeline_mode<synchronous>, transform_indices = @transform_6, window_bounds = array<i64: 32, 64>}, {pipeline_mode = #tpu.pipeline_mode<synchronous>, transform_indices = @transform_7, window_bounds = array<i64: 1, 64>}, {pipeline_mode = #tpu.pipeline_mode<synchronous>, transform_indices = @transform_8, window_bounds = array<i64: 1, 64>}, {pipeline_mode = #tpu.pipeline_mode<synchronous>, transform_indices = @transform_9, window_bounds = array<i64: 1, 64>}, {pipeline_mode = #tpu.pipeline_mode<synchronous>, transform_indices = @transform_10, window_bounds = array<i64: 64, 128>}, {pipeline_mode = #tpu.pipeline_mode<synchronous>, transform_indices = @transform_11, window_bounds = array<i64: 1, 128>}, {pipeline_mode = #tpu.pipeline_mode<synchronous>, transform_indices = @transform_12, window_bounds = array<i64: 1, 128>}, {pipeline_mode = #tpu.pipeline_mode<synchronous>, transform_indices = @transform_13, window_bounds = array<i64: 1, 128>}, {pipeline_mode = #tpu.pipeline_mode<synchronous>, transform_indices = @transform_14, window_bounds = array<i64: 2, 16>}, {pipeline_mode = #tpu.pipeline_mode<synchronous>, transform_indices = @transform_15, window_bounds = array<i64: 128, 32>}, {pipeline_mode = #tpu.pipeline_mode<synchronous>, transform_indices = @transform_16, window_bounds = array<i64: 1, 32>}, {pipeline_mode = #tpu.pipeline_mode<synchronous>, transform_indices = @transform_17, window_bounds = array<i64: 32, 4>}, {pipeline_mode = #tpu.pipeline_mode<synchronous>, transform_indices = @transform_18, window_bounds = array<i64: 1, 4>}, {pipeline_mode = #tpu.pipeline_mode<synchronous>, transform_indices = @transform_19, window_bounds = array<i64: 2, 4>}]} {
    %c0 = arith.constant 0 : index
    %c0_0 = arith.constant 0 : index
    %0 = vector.load %arg2[%c0, %c0_0] : memref<16x16xf32, #tpu.memory_space<vmem>>, vector<16x16xf32>
    %cst = arith.constant 0.000000e+00 : f32
    %1 = vector.broadcast %cst : f32 to vector<16x16xf32>
    %2 = arith.cmpf ogt, %0, %1 : vector<16x16xf32>
    %cst_1 = arith.constant 0.000000e+00 : f32
    %cst_2 = arith.constant -1.000000e+09 : f32
    %3 = vector.broadcast %cst_1 : f32 to vector<16x16xf32>
    %4 = vector.broadcast %cst_2 : f32 to vector<16x16xf32>
    %5 = arith.select %2, %3, %4 : vector<16x16xi1>, vector<16x16xf32>
    %c0_3 = arith.constant 0 : index
    %c0_4 = arith.constant 0 : index
    %6 = vector.load %arg1[%c0_3, %c0_4] : memref<16x8xf32, #tpu.memory_space<vmem>>, vector<16x8xf32>
    %7 = arith.truncf %6 : vector<16x8xf32> to vector<16x8xbf16>
    %c0_5 = arith.constant 0 : index
    %c0_6 = arith.constant 0 : index
    %8 = vector.load %arg3[%c0_5, %c0_6] : memref<8x32xbf16, #tpu.memory_space<vmem>>, vector<8x32xbf16>
    %cst_7 = arith.constant dense<0.000000e+00> : vector<16x32xf32>
    %9 = tpu.matmul %7, %8, %cst_7 {dimension_numbers = #tpu.dot_dimension_numbers<[1], [0], [0], [1], [0, 0, 1, 1], [], []>} : vector<16x8xbf16>, vector<8x32xbf16>, vector<16x32xf32> -> vector<16x32xf32>
    %c0_8 = arith.constant 0 : index
    %c0_9 = arith.constant 0 : index
    %10 = vector.load %arg4[%c0_8, %c0_9] : memref<1x32xf32, #tpu.memory_space<vmem>>, vector<1x32xf32>
    %c0_10 = arith.constant 0 : index
    %c0_11 = arith.constant 0 : index
    %11 = vector.load %arg5[%c0_10, %c0_11] : memref<1x32xf32, #tpu.memory_space<vmem>>, vector<1x32xf32>
    %12 = vector.broadcast %11 : vector<1x32xf32> to vector<16x32xf32>
    %13 = arith.mulf %9, %12 : vector<16x32xf32>
    %cst_12 = arith.constant dense<0.000000e+00> : vector<16xf32>
    %14 = vector.multi_reduction <add>, %13, %cst_12 [1] : vector<16x32xf32> to vector<16xf32>
    %15 = vector.shape_cast %14 : vector<16xf32> to vector<16x1xf32>
    %cst_13 = arith.constant dense<0.000000e+00> : vector<1x16xf32>
    %16 = tpu.matmul %10, %9, %cst_13 {dimension_numbers = #tpu.dot_dimension_numbers<[1], [1], [0], [0], [0, 0, 1, 0], [], []>} : vector<1x32xf32>, vector<16x32xf32>, vector<1x16xf32> -> vector<1x16xf32>
    %17 = vector.broadcast %15 : vector<16x1xf32> to vector<16x16xf32>
    %18 = vector.broadcast %16 : vector<1x16xf32> to vector<16x16xf32>
    %19 = arith.addf %17, %18 : vector<16x16xf32>
    %cst_14 = arith.constant 0.000000e+00 : f32
    %20 = vector.broadcast %cst_14 : f32 to vector<16x16xf32>
    %21 = arith.cmpf ogt, %19, %20 : vector<16x16xf32>
    %cst_15 = arith.constant 2.000000e-01 : f32
    %22 = vector.broadcast %cst_15 : f32 to vector<16x16xf32>
    %23 = arith.mulf %22, %19 : vector<16x16xf32>
    %24 = arith.select %21, %19, %23 : vector<16x16xi1>, vector<16x16xf32>
    %25 = arith.addf %24, %5 : vector<16x16xf32>
    %cst_16 = arith.constant dense<0xFF800000> : vector<16xf32>
    %26 = vector.multi_reduction <maximumf>, %25, %cst_16 [1] : vector<16x16xf32> to vector<16xf32>
    %27 = vector.shape_cast %26 : vector<16xf32> to vector<16x1xf32>
    %28 = vector.broadcast %27 : vector<16x1xf32> to vector<16x16xf32>
    %29 = arith.subf %25, %28 : vector<16x16xf32>
    %30 = math.exp %29 : vector<16x16xf32>
    %cst_17 = arith.constant dense<0.000000e+00> : vector<16xf32>
    %31 = vector.multi_reduction <add>, %30, %cst_17 [1] : vector<16x16xf32> to vector<16xf32>
    %32 = vector.shape_cast %31 : vector<16xf32> to vector<16x1xf32>
    %cst_18 = arith.constant 9.99999971E-10 : f32
    %33 = vector.broadcast %cst_18 : f32 to vector<16x1xf32>
    %34 = arith.maximumf %32, %33 : vector<16x1xf32>
    %35 = arith.truncf %30 : vector<16x16xf32> to vector<16x16xbf16>
    %36 = arith.truncf %9 : vector<16x32xf32> to vector<16x32xbf16>
    %cst_19 = arith.constant dense<0.000000e+00> : vector<16x32xf32>
    %37 = tpu.matmul %35, %36, %cst_19 {dimension_numbers = #tpu.dot_dimension_numbers<[1], [0], [0], [1], [0, 0, 1, 1], [], []>} : vector<16x16xbf16>, vector<16x32xbf16>, vector<16x32xf32> -> vector<16x32xf32>
    %38 = tpu.reciprocal %34 {approx = true} : vector<16x1xf32> -> vector<16x1xf32>
    %39 = vector.broadcast %38 : vector<16x1xf32> to vector<16x32xf32>
    %40 = arith.mulf %37, %39 : vector<16x32xf32>
    %c0_20 = arith.constant 0 : index
    %c0_21 = arith.constant 0 : index
    %41 = vector.load %arg6[%c0_20, %c0_21] : memref<1x32xf32, #tpu.memory_space<vmem>>, vector<1x32xf32>
    %42 = vector.broadcast %41 : vector<1x32xf32> to vector<16x32xf32>
    %43 = arith.addf %40, %42 : vector<16x32xf32>
    %cst_22 = arith.constant 0.000000e+00 : f32
    %44 = vector.broadcast %cst_22 : f32 to vector<16x32xf32>
    %45 = arith.maximumf %43, %44 : vector<16x32xf32>
    %46 = arith.truncf %45 : vector<16x32xf32> to vector<16x32xbf16>
    %c0_23 = arith.constant 0 : index
    %c0_24 = arith.constant 0 : index
    %47 = vector.load %arg7[%c0_23, %c0_24] : memref<32x64xbf16, #tpu.memory_space<vmem>>, vector<32x64xbf16>
    %cst_25 = arith.constant dense<0.000000e+00> : vector<16x64xf32>
    %48 = tpu.matmul %46, %47, %cst_25 {dimension_numbers = #tpu.dot_dimension_numbers<[1], [0], [0], [1], [0, 0, 1, 1], [], []>} : vector<16x32xbf16>, vector<32x64xbf16>, vector<16x64xf32> -> vector<16x64xf32>
    %c0_26 = arith.constant 0 : index
    %c0_27 = arith.constant 0 : index
    %49 = vector.load %arg8[%c0_26, %c0_27] : memref<1x64xf32, #tpu.memory_space<vmem>>, vector<1x64xf32>
    %c0_28 = arith.constant 0 : index
    %c0_29 = arith.constant 0 : index
    %50 = vector.load %arg9[%c0_28, %c0_29] : memref<1x64xf32, #tpu.memory_space<vmem>>, vector<1x64xf32>
    %51 = vector.broadcast %50 : vector<1x64xf32> to vector<16x64xf32>
    %52 = arith.mulf %48, %51 : vector<16x64xf32>
    %cst_30 = arith.constant dense<0.000000e+00> : vector<16xf32>
    %53 = vector.multi_reduction <add>, %52, %cst_30 [1] : vector<16x64xf32> to vector<16xf32>
    %54 = vector.shape_cast %53 : vector<16xf32> to vector<16x1xf32>
    %cst_31 = arith.constant dense<0.000000e+00> : vector<1x16xf32>
    %55 = tpu.matmul %49, %48, %cst_31 {dimension_numbers = #tpu.dot_dimension_numbers<[1], [1], [0], [0], [0, 0, 1, 0], [], []>} : vector<1x64xf32>, vector<16x64xf32>, vector<1x16xf32> -> vector<1x16xf32>
    %56 = vector.broadcast %54 : vector<16x1xf32> to vector<16x16xf32>
    %57 = vector.broadcast %55 : vector<1x16xf32> to vector<16x16xf32>
    %58 = arith.addf %56, %57 : vector<16x16xf32>
    %cst_32 = arith.constant 0.000000e+00 : f32
    %59 = vector.broadcast %cst_32 : f32 to vector<16x16xf32>
    %60 = arith.cmpf ogt, %58, %59 : vector<16x16xf32>
    %cst_33 = arith.constant 2.000000e-01 : f32
    %61 = vector.broadcast %cst_33 : f32 to vector<16x16xf32>
    %62 = arith.mulf %61, %58 : vector<16x16xf32>
    %63 = arith.select %60, %58, %62 : vector<16x16xi1>, vector<16x16xf32>
    %64 = arith.addf %63, %5 : vector<16x16xf32>
    %cst_34 = arith.constant dense<0xFF800000> : vector<16xf32>
    %65 = vector.multi_reduction <maximumf>, %64, %cst_34 [1] : vector<16x16xf32> to vector<16xf32>
    %66 = vector.shape_cast %65 : vector<16xf32> to vector<16x1xf32>
    %67 = vector.broadcast %66 : vector<16x1xf32> to vector<16x16xf32>
    %68 = arith.subf %64, %67 : vector<16x16xf32>
    %69 = math.exp %68 : vector<16x16xf32>
    %cst_35 = arith.constant dense<0.000000e+00> : vector<16xf32>
    %70 = vector.multi_reduction <add>, %69, %cst_35 [1] : vector<16x16xf32> to vector<16xf32>
    %71 = vector.shape_cast %70 : vector<16xf32> to vector<16x1xf32>
    %cst_36 = arith.constant 9.99999971E-10 : f32
    %72 = vector.broadcast %cst_36 : f32 to vector<16x1xf32>
    %73 = arith.maximumf %71, %72 : vector<16x1xf32>
    %74 = arith.truncf %69 : vector<16x16xf32> to vector<16x16xbf16>
    %75 = arith.truncf %48 : vector<16x64xf32> to vector<16x64xbf16>
    %cst_37 = arith.constant dense<0.000000e+00> : vector<16x64xf32>
    %76 = tpu.matmul %74, %75, %cst_37 {dimension_numbers = #tpu.dot_dimension_numbers<[1], [0], [0], [1], [0, 0, 1, 1], [], []>} : vector<16x16xbf16>, vector<16x64xbf16>, vector<16x64xf32> -> vector<16x64xf32>
    %77 = tpu.reciprocal %73 {approx = true} : vector<16x1xf32> -> vector<16x1xf32>
    %78 = vector.broadcast %77 : vector<16x1xf32> to vector<16x64xf32>
    %79 = arith.mulf %76, %78 : vector<16x64xf32>
    %c0_38 = arith.constant 0 : index
    %c0_39 = arith.constant 0 : index
    %80 = vector.load %arg10[%c0_38, %c0_39] : memref<1x64xf32, #tpu.memory_space<vmem>>, vector<1x64xf32>
    %81 = vector.broadcast %80 : vector<1x64xf32> to vector<16x64xf32>
    %82 = arith.addf %79, %81 : vector<16x64xf32>
    %cst_40 = arith.constant 0.000000e+00 : f32
    %83 = vector.broadcast %cst_40 : f32 to vector<16x64xf32>
    %84 = arith.maximumf %82, %83 : vector<16x64xf32>
    %85 = arith.truncf %84 : vector<16x64xf32> to vector<16x64xbf16>
    %c0_41 = arith.constant 0 : index
    %c0_42 = arith.constant 0 : index
    %86 = vector.load %arg11[%c0_41, %c0_42] : memref<64x128xbf16, #tpu.memory_space<vmem>>, vector<64x128xbf16>
    %cst_43 = arith.constant dense<0.000000e+00> : vector<16x128xf32>
    %87 = tpu.matmul %85, %86, %cst_43 {dimension_numbers = #tpu.dot_dimension_numbers<[1], [0], [0], [1], [0, 0, 1, 1], [], []>} : vector<16x64xbf16>, vector<64x128xbf16>, vector<16x128xf32> -> vector<16x128xf32>
    %c0_44 = arith.constant 0 : index
    %c0_45 = arith.constant 0 : index
    %88 = vector.load %arg12[%c0_44, %c0_45] : memref<1x128xf32, #tpu.memory_space<vmem>>, vector<1x128xf32>
    %c0_46 = arith.constant 0 : index
    %c0_47 = arith.constant 0 : index
    %89 = vector.load %arg13[%c0_46, %c0_47] : memref<1x128xf32, #tpu.memory_space<vmem>>, vector<1x128xf32>
    %90 = vector.broadcast %89 : vector<1x128xf32> to vector<16x128xf32>
    %91 = arith.mulf %87, %90 : vector<16x128xf32>
    %cst_48 = arith.constant dense<0.000000e+00> : vector<16xf32>
    %92 = vector.multi_reduction <add>, %91, %cst_48 [1] : vector<16x128xf32> to vector<16xf32>
    %93 = vector.shape_cast %92 : vector<16xf32> to vector<16x1xf32>
    %cst_49 = arith.constant dense<0.000000e+00> : vector<1x16xf32>
    %94 = tpu.matmul %88, %87, %cst_49 {dimension_numbers = #tpu.dot_dimension_numbers<[1], [1], [0], [0], [0, 0, 1, 0], [], []>} : vector<1x128xf32>, vector<16x128xf32>, vector<1x16xf32> -> vector<1x16xf32>
    %95 = vector.broadcast %93 : vector<16x1xf32> to vector<16x16xf32>
    %96 = vector.broadcast %94 : vector<1x16xf32> to vector<16x16xf32>
    %97 = arith.addf %95, %96 : vector<16x16xf32>
    %cst_50 = arith.constant 0.000000e+00 : f32
    %98 = vector.broadcast %cst_50 : f32 to vector<16x16xf32>
    %99 = arith.cmpf ogt, %97, %98 : vector<16x16xf32>
    %cst_51 = arith.constant 2.000000e-01 : f32
    %100 = vector.broadcast %cst_51 : f32 to vector<16x16xf32>
    %101 = arith.mulf %100, %97 : vector<16x16xf32>
    %102 = arith.select %99, %97, %101 : vector<16x16xi1>, vector<16x16xf32>
    %103 = arith.addf %102, %5 : vector<16x16xf32>
    %cst_52 = arith.constant dense<0xFF800000> : vector<16xf32>
    %104 = vector.multi_reduction <maximumf>, %103, %cst_52 [1] : vector<16x16xf32> to vector<16xf32>
    %105 = vector.shape_cast %104 : vector<16xf32> to vector<16x1xf32>
    %106 = vector.broadcast %105 : vector<16x1xf32> to vector<16x16xf32>
    %107 = arith.subf %103, %106 : vector<16x16xf32>
    %108 = math.exp %107 : vector<16x16xf32>
    %cst_53 = arith.constant dense<0.000000e+00> : vector<16xf32>
    %109 = vector.multi_reduction <add>, %108, %cst_53 [1] : vector<16x16xf32> to vector<16xf32>
    %110 = vector.shape_cast %109 : vector<16xf32> to vector<16x1xf32>
    %cst_54 = arith.constant 9.99999971E-10 : f32
    %111 = vector.broadcast %cst_54 : f32 to vector<16x1xf32>
    %112 = arith.maximumf %110, %111 : vector<16x1xf32>
    %113 = arith.truncf %108 : vector<16x16xf32> to vector<16x16xbf16>
    %114 = arith.truncf %87 : vector<16x128xf32> to vector<16x128xbf16>
    %cst_55 = arith.constant dense<0.000000e+00> : vector<16x128xf32>
    %115 = tpu.matmul %113, %114, %cst_55 {dimension_numbers = #tpu.dot_dimension_numbers<[1], [0], [0], [1], [0, 0, 1, 1], [], []>} : vector<16x16xbf16>, vector<16x128xbf16>, vector<16x128xf32> -> vector<16x128xf32>
    %116 = tpu.reciprocal %112 {approx = true} : vector<16x1xf32> -> vector<16x1xf32>
    %117 = vector.broadcast %116 : vector<16x1xf32> to vector<16x128xf32>
    %118 = arith.mulf %115, %117 : vector<16x128xf32>
    %c0_56 = arith.constant 0 : index
    %c0_57 = arith.constant 0 : index
    %119 = vector.load %arg14[%c0_56, %c0_57] : memref<1x128xf32, #tpu.memory_space<vmem>>, vector<1x128xf32>
    %120 = vector.broadcast %119 : vector<1x128xf32> to vector<16x128xf32>
    %121 = arith.addf %118, %120 : vector<16x128xf32>
    %c0_58 = arith.constant 0 : index
    %c0_59 = arith.constant 0 : index
    %122 = vector.load %arg15[%c0_58, %c0_59] : memref<2x16xbf16, #tpu.memory_space<vmem>>, vector<2x16xbf16>
    %123 = arith.truncf %121 : vector<16x128xf32> to vector<16x128xbf16>
    %cst_60 = arith.constant dense<0.000000e+00> : vector<2x128xf32>
    %124 = tpu.matmul %122, %123, %cst_60 {dimension_numbers = #tpu.dot_dimension_numbers<[1], [0], [0], [1], [0, 0, 1, 1], [], []>} : vector<2x16xbf16>, vector<16x128xbf16>, vector<2x128xf32> -> vector<2x128xf32>
    %125 = arith.truncf %124 : vector<2x128xf32> to vector<2x128xbf16>
    %c0_61 = arith.constant 0 : index
    %c0_62 = arith.constant 0 : index
    %126 = vector.load %arg16[%c0_61, %c0_62] : memref<128x32xbf16, #tpu.memory_space<vmem>>, vector<128x32xbf16>
    %cst_63 = arith.constant dense<0.000000e+00> : vector<2x32xf32>
    %127 = tpu.matmul %125, %126, %cst_63 {dimension_numbers = #tpu.dot_dimension_numbers<[1], [0], [0], [1], [0, 0, 1, 1], [], []>} : vector<2x128xbf16>, vector<128x32xbf16>, vector<2x32xf32> -> vector<2x32xf32>
    %c0_64 = arith.constant 0 : index
    %c0_65 = arith.constant 0 : index
    %128 = vector.load %arg17[%c0_64, %c0_65] : memref<1x32xf32, #tpu.memory_space<vmem>>, vector<1x32xf32>
    %129 = vector.broadcast %128 : vector<1x32xf32> to vector<2x32xf32>
    %130 = arith.addf %127, %129 : vector<2x32xf32>
    %cst_66 = arith.constant 0.000000e+00 : f32
    %131 = vector.broadcast %cst_66 : f32 to vector<2x32xf32>
    %132 = arith.maximumf %130, %131 : vector<2x32xf32>
    %133 = arith.truncf %132 : vector<2x32xf32> to vector<2x32xbf16>
    %c0_67 = arith.constant 0 : index
    %c0_68 = arith.constant 0 : index
    %134 = vector.load %arg18[%c0_67, %c0_68] : memref<32x4xbf16, #tpu.memory_space<vmem>>, vector<32x4xbf16>
    %cst_69 = arith.constant dense<0.000000e+00> : vector<2x4xf32>
    %135 = tpu.matmul %133, %134, %cst_69 {dimension_numbers = #tpu.dot_dimension_numbers<[1], [0], [0], [1], [0, 0, 1, 1], [], []>} : vector<2x32xbf16>, vector<32x4xbf16>, vector<2x4xf32> -> vector<2x4xf32>
    %c0_70 = arith.constant 0 : index
    %c0_71 = arith.constant 0 : index
    %136 = vector.load %arg19[%c0_70, %c0_71] : memref<1x4xf32, #tpu.memory_space<vmem>>, vector<1x4xf32>
    %137 = vector.broadcast %136 : vector<1x4xf32> to vector<2x4xf32>
    %138 = arith.addf %135, %137 : vector<2x4xf32>
    %cst_72 = arith.constant dense<0xFF800000> : vector<4xf32>
    %139 = vector.multi_reduction <maximumf>, %138, %cst_72 [0] : vector<2x4xf32> to vector<4xf32>
    %140 = vector.shape_cast %139 : vector<4xf32> to vector<1x4xf32>
    %141 = vector.broadcast %140 : vector<1x4xf32> to vector<2x4xf32>
    %142 = arith.subf %138, %141 : vector<2x4xf32>
    %143 = math.exp %142 : vector<2x4xf32>
    %cst_73 = arith.constant dense<0.000000e+00> : vector<4xf32>
    %144 = vector.multi_reduction <add>, %143, %cst_73 [0] : vector<2x4xf32> to vector<4xf32>
    %145 = vector.shape_cast %144 : vector<4xf32> to vector<1x4xf32>
    %146 = math.log %145 : vector<1x4xf32>
    %147 = arith.addf %146, %140 : vector<1x4xf32>
    %148 = vector.broadcast %147 : vector<1x4xf32> to vector<2x4xf32>
    %149 = arith.subf %138, %148 : vector<2x4xf32>
    %c0_74 = arith.constant 0 : index
    %c0_75 = arith.constant 0 : index
    %150 = vector.load %arg20[%c0_74, %c0_75] : memref<2x4xf32, #tpu.memory_space<vmem>>, vector<2x4xf32>
    tpu.vector_store %arg20[%c0_74, %c0_75], %149 {strides = array<i32>} : memref<2x4xf32, #tpu.memory_space<vmem>>, vector<2x4xf32>,
    return
  }
  func.func @transform_0(%arg0: i32) -> (i32, i32) {
    %c0_i32 = arith.constant 0 : i32
    %c0_i32_0 = arith.constant 0 : i32
    %c0_i32_1 = arith.constant 0 : i32
    return %c0_i32, %c0_i32_0 : i32, i32
  }
  func.func @transform_1(%arg0: i32) -> (i32, i32) {
    %c0_i32 = arith.constant 0 : i32
    %c0_i32_0 = arith.constant 0 : i32
    %c0_i32_1 = arith.constant 0 : i32
    return %c0_i32, %c0_i32_0 : i32, i32
  }
  func.func @transform_2(%arg0: i32) -> (i32, i32) {
    %c0_i32 = arith.constant 0 : i32
    %c0_i32_0 = arith.constant 0 : i32
    %c0_i32_1 = arith.constant 0 : i32
    return %c0_i32, %c0_i32_0 : i32, i32
  }
  func.func @transform_3(%arg0: i32) -> (i32, i32) {
    %c0_i32 = arith.constant 0 : i32
    %c0_i32_0 = arith.constant 0 : i32
    %c0_i32_1 = arith.constant 0 : i32
    return %c0_i32, %c0_i32_0 : i32, i32
  }
  func.func @transform_4(%arg0: i32) -> (i32, i32) {
    %c0_i32 = arith.constant 0 : i32
    %c0_i32_0 = arith.constant 0 : i32
    %c0_i32_1 = arith.constant 0 : i32
    return %c0_i32, %c0_i32_0 : i32, i32
  }
  func.func @transform_5(%arg0: i32) -> (i32, i32) {
    %c0_i32 = arith.constant 0 : i32
    %c0_i32_0 = arith.constant 0 : i32
    %c0_i32_1 = arith.constant 0 : i32
    return %c0_i32, %c0_i32_0 : i32, i32
  }
  func.func @transform_6(%arg0: i32) -> (i32, i32) {
    %c0_i32 = arith.constant 0 : i32
    %c0_i32_0 = arith.constant 0 : i32
    %c0_i32_1 = arith.constant 0 : i32
    return %c0_i32, %c0_i32_0 : i32, i32
  }
  func.func @transform_7(%arg0: i32) -> (i32, i32) {
    %c0_i32 = arith.constant 0 : i32
    %c0_i32_0 = arith.constant 0 : i32
    %c0_i32_1 = arith.constant 0 : i32
    return %c0_i32, %c0_i32_0 : i32, i32
  }
  func.func @transform_8(%arg0: i32) -> (i32, i32) {
    %c0_i32 = arith.constant 0 : i32
    %c0_i32_0 = arith.constant 0 : i32
    %c0_i32_1 = arith.constant 0 : i32
    return %c0_i32, %c0_i32_0 : i32, i32
  }
  func.func @transform_9(%arg0: i32) -> (i32, i32) {
    %c0_i32 = arith.constant 0 : i32
    %c0_i32_0 = arith.constant 0 : i32
    %c0_i32_1 = arith.constant 0 : i32
    return %c0_i32, %c0_i32_0 : i32, i32
  }
  func.func @transform_10(%arg0: i32) -> (i32, i32) {
    %c0_i32 = arith.constant 0 : i32
    %c0_i32_0 = arith.constant 0 : i32
    %c0_i32_1 = arith.constant 0 : i32
    return %c0_i32, %c0_i32_0 : i32, i32
  }
  func.func @transform_11(%arg0: i32) -> (i32, i32) {
    %c0_i32 = arith.constant 0 : i32
    %c0_i32_0 = arith.constant 0 : i32
    %c0_i32_1 = arith.constant 0 : i32
    return %c0_i32, %c0_i32_0 : i32, i32
  }
  func.func @transform_12(%arg0: i32) -> (i32, i32) {
    %c0_i32 = arith.constant 0 : i32
    %c0_i32_0 = arith.constant 0 : i32
    %c0_i32_1 = arith.constant 0 : i32
    return %c0_i32, %c0_i32_0 : i32, i32
  }
  func.func @transform_13(%arg0: i32) -> (i32, i32) {
    %c0_i32 = arith.constant 0 : i32
    %c0_i32_0 = arith.constant 0 : i32
    %c0_i32_1 = arith.constant 0 : i32
    return %c0_i32, %c0_i32_0 : i32, i32
  }
  func.func @transform_14(%arg0: i32) -> (i32, i32) {
    %c0_i32 = arith.constant 0 : i32
    %c0_i32_0 = arith.constant 0 : i32
    %c0_i32_1 = arith.constant 0 : i32
    return %c0_i32, %c0_i32_0 : i32, i32
  }
  func.func @transform_15(%arg0: i32) -> (i32, i32) {
    %c0_i32 = arith.constant 0 : i32
    %c0_i32_0 = arith.constant 0 : i32
    %c0_i32_1 = arith.constant 0 : i32
    return %c0_i32, %c0_i32_0 : i32, i32
  }
  func.func @transform_16(%arg0: i32) -> (i32, i32) {
    %c0_i32 = arith.constant 0 : i32
    %c0_i32_0 = arith.constant 0 : i32
    %c0_i32_1 = arith.constant 0 : i32
    return %c0_i32, %c0_i32_0 : i32, i32
  }
  func.func @transform_17(%arg0: i32) -> (i32, i32) {
    %c0_i32 = arith.constant 0 : i32
    %c0_i32_0 = arith.constant 0 : i32
    %c0_i32_1 = arith.constant 0 : i32
    return %c0_i32, %c0_i32_0 : i32, i32
  }
  func.func @transform_18(%arg0: i32) -> (i32, i32) {
    %c0_i32 = arith.constant 0 : i32
    %c0_i32_0 = arith.constant 0 : i32
    %c0_i32_1 = arith.constant 0 : i32
    return %c0_i32, %c0_i32_0 : i32, i32
  }
  func.func @transform_19(%arg0: i32) -> (i32, i32) {
    %c0_i32 = arith.constant 0 : i32
    %c0_i32_0 = arith.constant 0 : i32
    %c0_i32_1 = arith.constant 0 : i32
    return %c0_i32, %c0_i32_0 : i32, i32
  }
}

</mosaic_0001>

<bundles_post_ra>
// kernel: gat_forward.1
= control target key start
LH: loop header
LB: loop body
LE: loop exit
PB: predicated region body
PF: predicated region fallthrough
CT: control target
= control target key end

     0   :  { %s2534_s0 = inlined_call_operand.hbm [shape: f32[16,8], index: 0, kind: input, shape index: {}]   ;;  %s2535_s1 = inlined_call_operand.hbm [shape: f32[16,16], index: 1, kind: input, shape index: {}]   ;;  %s2536_s2 = inlined_call_operand.hbm [shape: bf16[8,32], index: 2, kind: input, shape index: {}]   ;;  %s2537_s3 = inlined_call_operand.hbm [shape: f32[1,32], index: 3, kind: input, shape index: {}]   ;;  %s2538_s4 = inlined_call_operand.hbm [shape: f32[1,32], index: 4, kind: input, shape index: {}]   ;;  %s2539_s5 = inlined_call_operand.hbm [shape: f32[1,32], index: 5, kind: input, shape index: {}]   ;;  %s2540_s6 = inlined_call_operand.hbm [shape: bf16[32,64], index: 6, kind: input, shape index: {}]   ;;  %s2541_s7 = inlined_call_operand.hbm [shape: f32[1,64], index: 7, kind: input, shape index: {}]   ;;  %s2542_s8 = inlined_call_operand.hbm [shape: f32[1,64], index: 8, kind: input, shape index: {}]   ;;  %s2543_s9 = inlined_call_operand.hbm [shape: f32[1,64], index: 9, kind: input, shape index: {}]   ;;  %s2544_s10 = inlined_call_operand.hbm [shape: bf16[64,128], index: 10, kind: input, shape index: {}]   ;;  %s2545_s11 = inlined_call_operand.hbm [shape: f32[1,128], index: 11, kind: input, shape index: {}]   ;;  %s2546_s12 = inlined_call_operand.hbm [shape: f32[1,128], index: 12, kind: input, shape index: {}]   ;;  %s2547_s13 = inlined_call_operand.hbm [shape: f32[1,128], index: 13, kind: input, shape index: {}]   ;;  %s2548_s14 = inlined_call_operand.hbm [shape: bf16[2,16], index: 14, kind: input, shape index: {}]   ;;  %s2549_s15 = inlined_call_operand.hbm [shape: bf16[128,32], index: 15, kind: input, shape index: {}]   ;;  %s2550_s16 = inlined_call_operand.hbm [shape: f32[1,32], index: 16, kind: input, shape index: {}]   ;;  %s2551_s17 = inlined_call_operand.hbm [shape: bf16[32,4], index: 17, kind: input, shape index: {}]   ;;  %s2552_s18 = inlined_call_operand.hbm [shape: f32[1,4], index: 18, kind: input, shape index: {}]   ;;  %s2553_s19 = inlined_call_operand.hbm [shape: f32[2,4], index: 19, kind: output, shape index: {}]  }
   0x1   :  { %2560 = sst [smem:[#allocation44_spill]] %s2534_s0 }
   0x2   :  { %2561 = sst [smem:[#allocation45_spill]] %s2535_s1 }
   0x3   :  { %2562 = sst [smem:[#allocation46_spill]] %s2536_s2 }
   0x4   :  { %2563 = sst [smem:[#allocation47_spill]] %s2537_s3 }
   0x5   :  { %24 = vsyncpa [#allocation3], 0 }
   0x6   :  { %25 = vsyncpa [#allocation6], 0 }
   0x7   :  { %26 = vsyncpa [#allocation9], 0 }
   0x8   :  { %27 = vsyncpa [#allocation12], 0 }
   0x9   :  { %28 = vsyncpa [#allocation15], 0 }
   0xa   :  { %29 = vsyncpa [#allocation18], 0 }
   0xb   :  { %30 = vsyncpa [#allocation21], 0 }
   0xc   :  { %31 = vsyncpa [#allocation24], 0 }
   0xd   :  { %32 = vsyncpa [#allocation27], 0 }
   0xe   :  { %33 = vsyncpa [#allocation30], 0 }
   0xf   :  { %34 = vsyncpa [#allocation4], 0  ;;  %s2045_s0 = smov [#allocation5]   ;;  %s2046_s20 = smov [#allocation8]  }
  0x10   :  { %s52_s30 = sshll.u32 %s2045_s0, 4  ;;  %s75_s21 = sshll.u32 %s2046_s20, 4  ;;  %s53_s30 = int_to_ptr.vmem [resolvable:$true] %s52_s30  ;;  %s2173_s21 = int_to_ptr.vmem [resolvable:$true] %s75_s21 }
  0x11   :  { %s2564_s2 = sld [smem:[#allocation45_spill]] }
  0x17   :  { %s1583_s23 = scalar_lea.hbm %s2564_s2, 256 }
  0x18   :  { %p1584_p0 = scmp.ne.s32.totalorder %s2564_s2, %s1583_s23  ;;  %p1587_p1 = scmp.lt.u32.totalorder %s1583_s23, %s2564_s2 }
  0x1a   :  { %p1589_p2 = pnand %p1587_p1, %p1584_p0 }
  0x1c   :  { %1592 = shalt.err (!%p1589_p2)
}
  0x1d   :  { %s1593_s27 = scalar_lea.vmem %s53_s30, 256  ;;  %p1598_p4 = scmp.lt.s32.totalorder %s53_s30, %s53_s30 }
  0x1e   :  { %p1594_p3 = scmp.ne.s32.totalorder %s53_s30, %s1593_s27  ;;  %p1599_p5 = scmp.lt.s32.totalorder %s1593_s27, %s1593_s27 }
  0x20   :  { %p1600_p6 = por %p1599_p5, %p1598_p4 }
  0x22   :  { %p1601_p7 = pnand %p1600_p6, %p1594_p3 }
  0x24   :  { %1604 = shalt.err (!%p1601_p7)
}
  0x25   :  { %s2558_s28 = smov 128   ;;  %s2559_s29 = smov 8  }
  0x26   :  { %58 = dma.hbm_to_vmem [thread:$0]  %s2564_s2, 256, %s53_s30, [#allocation6], %s2558_s28, %s2558_s28, %s2559_s29  }
  0x27   :  { %s2565_s23 = sld [smem:[#allocation47_spill]] }
  0x2d   :  { %s1605_s24 = scalar_lea.hbm %s2565_s23, 16 }
  0x2e   :  { %p1606_p8 = scmp.ne.s32.totalorder %s2565_s23, %s1605_s24  ;;  %p1609_p9 = scmp.lt.u32.totalorder %s1605_s24, %s2565_s23 }
  0x30   :  { %p1611_p10 = pnand %p1609_p9, %p1606_p8 }
  0x32   :  { %1614 = shalt.err (!%p1611_p10)
}
  0x33   :  { %s1615_s0 = scalar_lea.vmem %s2173_s21, 16  ;;  %s1619_s30 = scalar_lea.vmem %s2173_s21, 32 }
  0x34   :  { %p1616_p11 = scmp.ne.s32.totalorder %s2173_s21, %s1615_s0  ;;  %p1620_p12 = scmp.lt.s32.totalorder %s2173_s21, %s2173_s21 }
  0x35   :  { %p1621_p13 = scmp.lt.s32.totalorder %s1619_s30, %s1615_s0 }
  0x37   :  { %p1622_p0 = por %p1621_p13, %p1620_p12 }
  0x39   :  { %p1623_p1 = pnand %p1622_p0, %p1616_p11 }
  0x3b   :  { %1626 = shalt.err (!%p1623_p1)
}
  0x3c   :  { %78 = dma.hbm_to_vmem [thread:$0]  %s2565_s23, 16, %s2173_s21, [#allocation9]  }
  0x3d   :  { %s2049_s1 = smov [#allocation11]   ;;  %s2050_s24 = smov [#allocation14]  }
  0x3e   :  { %s95_s22 = sshll.u32 %s2049_s1, 4  ;;  %s117_s25 = sshll.u32 %s2050_s24, 4  ;;  %s96_s22 = int_to_ptr.vmem [resolvable:$true] %s95_s22  ;;  %s118_s25 = int_to_ptr.vmem [resolvable:$true] %s117_s25 }
  0x3f   :  { %s1627_s27 = scalar_lea.hbm %s2539_s5, 16 }
  0x40   :  { %p1628_p2 = scmp.ne.s32.totalorder %s2539_s5, %s1627_s27  ;;  %p1631_p3 = scmp.lt.u32.totalorder %s1627_s27, %s2539_s5 }
  0x42   :  { %p1633_p4 = pnand %p1631_p3, %p1628_p2 }
  0x44   :  { %1636 = shalt.err (!%p1633_p4)
}
  0x45   :  { %s1637_s21 = scalar_lea.vmem %s96_s22, 16  ;;  %s1641_s23 = scalar_lea.vmem %s96_s22, 32 }
  0x46   :  { %p1638_p5 = scmp.ne.s32.totalorder %s96_s22, %s1637_s21  ;;  %p1642_p6 = scmp.lt.s32.totalorder %s96_s22, %s96_s22 }
  0x47   :  { %p1643_p7 = scmp.lt.s32.totalorder %s1641_s23, %s1637_s21 }
  0x49   :  { %p1644_p8 = por %p1643_p7, %p1642_p6 }
  0x4b   :  { %p1645_p9 = pnand %p1644_p8, %p1638_p5 }
  0x4d   :  { %1648 = shalt.err (!%p1645_p9)
}
  0x4e   :  { %98 = dma.hbm_to_vmem [thread:$0]  %s2539_s5, 16, %s96_s22, [#allocation12]  }
  0x4f   :  { %s1649_s24 = scalar_lea.hbm %s2541_s7, 16 }
  0x50   :  { %p1650_p10 = scmp.ne.s32.totalorder %s2541_s7, %s1649_s24  ;;  %p1653_p11 = scmp.lt.u32.totalorder %s1649_s24, %s2541_s7 }
  0x52   :  { %p1655_p12 = pnand %p1653_p11, %p1650_p10 }
  0x54   :  { %1658 = shalt.err (!%p1655_p12)
}
  0x55   :  { %s1659_s0 = scalar_lea.vmem %s118_s25, 16  ;;  %s1663_s30 = scalar_lea.vmem %s118_s25, 32 }
  0x56   :  { %p1660_p13 = scmp.ne.s32.totalorder %s118_s25, %s1659_s0  ;;  %p1664_p0 = scmp.lt.s32.totalorder %s118_s25, %s118_s25 }
  0x57   :  { %p1665_p1 = scmp.lt.s32.totalorder %s1663_s30, %s1659_s0 }
  0x59   :  { %p1666_p2 = por %p1665_p1, %p1664_p0 }
  0x5b   :  { %p1667_p3 = pnand %p1666_p2, %p1660_p13 }
  0x5d   :  { %1670 = shalt.err (!%p1667_p3)
}
  0x5e   :  { %120 = dma.hbm_to_vmem [thread:$0]  %s2541_s7, 16, %s118_s25, [#allocation15]  }
  0x5f   :  { %s2051_s21 = smov [#allocation17]   ;;  %s2052_s2 = smov [#allocation20]  }
  0x60   :  { %s137_s23 = sshll.u32 %s2051_s21, 4  ;;  %s159_s20 = sshll.u32 %s2052_s2, 4  ;;  %s138_s23 = int_to_ptr.vmem [resolvable:$true] %s137_s23  ;;  %s160_s20 = int_to_ptr.vmem [resolvable:$true] %s159_s20 }
  0x61   :  { %s1671_s24 = scalar_lea.hbm %s2543_s9, 16 }
  0x62   :  { %p1672_p4 = scmp.ne.s32.totalorder %s2543_s9, %s1671_s24  ;;  %p1675_p5 = scmp.lt.u32.totalorder %s1671_s24, %s2543_s9 }
  0x64   :  { %p1677_p6 = pnand %p1675_p5, %p1672_p4 }
  0x66   :  { %1680 = shalt.err (!%p1677_p6)
}
  0x67   :  { %s1681_s7 = scalar_lea.vmem %s138_s23, 16  ;;  %s1685_s25 = scalar_lea.vmem %s138_s23, 32 }
  0x68   :  { %p1682_p7 = scmp.ne.s32.totalorder %s138_s23, %s1681_s7  ;;  %p1686_p8 = scmp.lt.s32.totalorder %s138_s23, %s138_s23 }
  0x69   :  { %p1687_p9 = scmp.lt.s32.totalorder %s1685_s25, %s1681_s7 }
  0x6b   :  { %p1688_p10 = por %p1687_p9, %p1686_p8 }
  0x6d   :  { %p1689_p11 = pnand %p1688_p10, %p1682_p7 }
  0x6f   :  { %1692 = shalt.err (!%p1689_p11)
}
  0x70   :  { %140 = dma.hbm_to_vmem [thread:$0]  %s2543_s9, 16, %s138_s23, [#allocation18]  }
  0x71   :  { %s1693_s21 = scalar_lea.hbm %s2545_s11, 16 }
  0x72   :  { %p1694_p12 = scmp.ne.s32.totalorder %s2545_s11, %s1693_s21  ;;  %p1697_p13 = scmp.lt.u32.totalorder %s1693_s21, %s2545_s11 }
  0x74   :  { %p1699_p0 = pnand %p1697_p13, %p1694_p12 }
  0x76   :  { %1702 = shalt.err (!%p1699_p0)
}
  0x77   :  { %s1703_s29 = scalar_lea.vmem %s160_s20, 16  ;;  %s1707_s3 = scalar_lea.vmem %s160_s20, 32 }
  0x78   :  { %p1704_p1 = scmp.ne.s32.totalorder %s160_s20, %s1703_s29  ;;  %p1708_p2 = scmp.lt.s32.totalorder %s160_s20, %s160_s20 }
  0x79   :  { %p1709_p3 = scmp.lt.s32.totalorder %s1707_s3, %s1703_s29 }
  0x7b   :  { %p1710_p4 = por %p1709_p3, %p1708_p2 }
  0x7d   :  { %p1711_p5 = pnand %p1710_p4, %p1704_p1 }
  0x7f   :  { %1714 = shalt.err (!%p1711_p5)
}
  0x80   :  { %162 = dma.hbm_to_vmem [thread:$0]  %s2545_s11, 16, %s160_s20, [#allocation21]  }
  0x81   :  { %s2053_s26 = smov [#allocation23]   ;;  %s1715_s0 = scalar_lea.hbm %s2547_s13, 16 }
  0x82   :  { %s179_s27 = sshll.u32 %s2053_s26, 4  ;;  %p1716_p6 = scmp.ne.s32.totalorder %s2547_s13, %s1715_s0  ;;  %s180_s27 = int_to_ptr.vmem [resolvable:$true] %s179_s27 }
  0x83   :  { %p1719_p7 = scmp.lt.u32.totalorder %s1715_s0, %s2547_s13 }
  0x85   :  { %p1721_p8 = pnand %p1719_p7, %p1716_p6 }
  0x87   :  { %1724 = shalt.err (!%p1721_p8)
}
  0x88   :  { %s1725_s2 = scalar_lea.vmem %s180_s27, 16  ;;  %s1729_s11 = scalar_lea.vmem %s180_s27, 32 }
  0x89   :  { %p1726_p9 = scmp.ne.s32.totalorder %s180_s27, %s1725_s2  ;;  %p1730_p10 = scmp.lt.s32.totalorder %s180_s27, %s180_s27 }
  0x8a   :  { %p1731_p11 = scmp.lt.s32.totalorder %s1729_s11, %s1725_s2 }
  0x8c   :  { %p1732_p12 = por %p1731_p11, %p1730_p10 }
  0x8e   :  { %p1733_p13 = pnand %p1732_p12, %p1726_p9 }
  0x90   :  { %1736 = shalt.err (!%p1733_p13)
}
  0x91   :  { %182 = dma.hbm_to_vmem [thread:$0]  %s2547_s13, 16, %s180_s27, [#allocation24]  }
  0x92   :  { %s2054_s1 = smov [#allocation26]   ;;  %s2055_s29 = smov [#allocation29]  }
  0x93   :  { %s198_s24 = sshll.u32 %s2054_s1, 4  ;;  %s220_s3 = sshll.u32 %s2055_s29, 4  ;;  %s199_s24 = int_to_ptr.vmem [resolvable:$true] %s198_s24  ;;  %s221_s3 = int_to_ptr.vmem [resolvable:$true] %s220_s3 }
  0x94   :  { %s1737_s26 = scalar_lea.hbm %s2549_s15, 1024 }
  0x95   :  { %p1738_p0 = scmp.ne.s32.totalorder %s2549_s15, %s1737_s26  ;;  %p1741_p1 = scmp.lt.u32.totalorder %s1737_s26, %s2549_s15 }
  0x97   :  { %p1743_p2 = pnand %p1741_p1, %p1738_p0 }
  0x99   :  { %1746 = shalt.err (!%p1743_p2)
}
  0x9a   :  { %s1747_s13 = scalar_lea.vmem %s199_s24, 1024  ;;  %p1752_p4 = scmp.lt.s32.totalorder %s199_s24, %s199_s24 }
  0x9b   :  { %p1748_p3 = scmp.ne.s32.totalorder %s199_s24, %s1747_s13  ;;  %p1753_p5 = scmp.lt.s32.totalorder %s1747_s13, %s1747_s13 }
  0x9d   :  { %p1754_p6 = por %p1753_p5, %p1752_p4 }
  0x9f   :  { %p1755_p7 = pnand %p1754_p6, %p1748_p3 }
  0xa1   :  { %1758 = shalt.err (!%p1755_p7)
}
  0xa2   :  { %s2056_s27 = smov 64   ;;  %s2057_s5 = smov 4  }
  0xa3   :  { %204 = dma.hbm_to_vmem [thread:$0]  %s2549_s15, 1024, %s199_s24, [#allocation27], %s2056_s27, %s2056_s27, %s2057_s5  }
  0xa4   :  { %s1759_s20 = scalar_lea.hbm %s2551_s17, 256 }
  0xa5   :  { %p1760_p8 = scmp.ne.s32.totalorder %s2551_s17, %s1759_s20  ;;  %p1763_p9 = scmp.lt.u32.totalorder %s1759_s20, %s2551_s17 }
  0xa7   :  { %p1765_p10 = pnand %p1763_p9, %p1760_p8 }
  0xa9   :  { %1768 = shalt.err (!%p1765_p10)
}
  0xaa   :  { %s1769_s23 = scalar_lea.vmem %s221_s3, 256  ;;  %p1774_p12 = scmp.lt.s32.totalorder %s221_s3, %s221_s3 }
  0xab   :  { %p1770_p11 = scmp.ne.s32.totalorder %s221_s3, %s1769_s23  ;;  %p1775_p13 = scmp.lt.s32.totalorder %s1769_s23, %s1769_s23 }
  0xad   :  { %p1776_p0 = por %p1775_p13, %p1774_p12 }
  0xaf   :  { %p1777_p1 = pnand %p1776_p0, %p1770_p11 }
  0xb1   :  { %1780 = shalt.err (!%p1777_p1)
}
  0xb2   :  { %226 = dma.hbm_to_vmem [thread:$0]  %s2551_s17, 256, %s221_s3, [#allocation30], %s2056_s27, %s2056_s27, %s2057_s5  }
  0xb3   :  { %s2058_s26 = smov [#allocation2]   ;;  %s2059_s25 = smov [#allocation7]  }
  0xb4   :  { %s40_s7 = sshll.u32 %s2058_s26, 4  ;;  %s65_s0 = sshll.u32 %s2059_s25, 4  ;;  %s41_s7 = int_to_ptr.vmem [resolvable:$true] %s40_s7  ;;  %s66_s0 = int_to_ptr.vmem [resolvable:$true] %s65_s0 }
  0xb5   :  { %s2566_s22 = sld [smem:[#allocation44_spill]] }
  0xbb   :  { %s1781_s21 = scalar_lea.hbm %s2566_s22, 256 }
  0xbc   :  { %p1782_p2 = scmp.ne.s32.totalorder %s2566_s22, %s1781_s21  ;;  %p1785_p3 = scmp.lt.u32.totalorder %s1781_s21, %s2566_s22 }
  0xbe   :  { %p1787_p4 = pnand %p1785_p3, %p1782_p2 }
  0xc0   :  { %1790 = shalt.err (!%p1787_p4)
}
  0xc1   :  { %s1791_s17 = scalar_lea.vmem %s41_s7, 256  ;;  %p1796_p6 = scmp.lt.s32.totalorder %s41_s7, %s41_s7 }
  0xc2   :  { %p1792_p5 = scmp.ne.s32.totalorder %s41_s7, %s1791_s17  ;;  %p1797_p7 = scmp.lt.s32.totalorder %s1791_s17, %s1791_s17 }
  0xc4   :  { %p1798_p8 = por %p1797_p7, %p1796_p6 }
  0xc6   :  { %p1799_p9 = pnand %p1798_p8, %p1792_p5 }
  0xc8   :  { %1802 = shalt.err (!%p1799_p9)
}
  0xc9   :  { %s2567_s3 = smov 8   ;;  %s2568_s1 = smov 128  }
  0xca   :  { %46 = dma.hbm_to_vmem [thread:$0]  %s2566_s22, 256, %s41_s7, [#allocation3], %s2568_s1, %s2568_s1, %s2567_s3  }
  0xcb   :  { %s2569_s24 = sld [smem:[#allocation46_spill]] }
  0xd1   :  { %s1803_s26 = scalar_lea.hbm %s2569_s24, 64 }
  0xd2   :  { %p1804_p10 = scmp.ne.s32.totalorder %s2569_s24, %s1803_s26  ;;  %p1807_p11 = scmp.lt.u32.totalorder %s1803_s26, %s2569_s24 }
  0xd4   :  { %p1809_p12 = pnand %p1807_p11, %p1804_p10 }
  0xd6   :  { %1812 = shalt.err (!%p1809_p12)
}
  0xd7   :  { %s1813_s2 = scalar_lea.vmem %s66_s0, 64  ;;  %p1818_p0 = scmp.lt.s32.totalorder %s66_s0, %s66_s0 }
  0xd8   :  { %p1814_p13 = scmp.ne.s32.totalorder %s66_s0, %s1813_s2  ;;  %p1819_p1 = scmp.lt.s32.totalorder %s1813_s2, %s1813_s2 }
  0xda   :  { %p1820_p2 = por %p1819_p1, %p1818_p0 }
  0xdc   :  { %p1821_p3 = pnand %p1820_p2, %p1814_p13 }
  0xde   :  { %1824 = shalt.err (!%p1821_p3)
}
  0xdf   :  { %68 = dma.hbm_to_vmem [thread:$0]  %s2569_s24, 64, %s66_s0, [#allocation6]  }
  0xe0   :  { %s2060_s11 = smov [#allocation10]   ;;  %s2061_s28 = smov [#allocation13]  }
  0xe1   :  { %s85_s20 = sshll.u32 %s2060_s11, 4  ;;  %s104_s17 = sshll.u32 %s2061_s28, 4  ;;  %s86_s20 = int_to_ptr.vmem [resolvable:$true] %s85_s20  ;;  %s105_s17 = int_to_ptr.vmem [resolvable:$true] %s104_s17 }
  0xe2   :  { %s1825_s29 = scalar_lea.hbm %s2538_s4, 16 }
  0xe3   :  { %p1826_p4 = scmp.ne.s32.totalorder %s2538_s4, %s1825_s29  ;;  %p1829_p5 = scmp.lt.u32.totalorder %s1825_s29, %s2538_s4 }
  0xe5   :  { %p1831_p6 = pnand %p1829_p5, %p1826_p4 }
  0xe7   :  { %1834 = shalt.err (!%p1831_p6)
}
  0xe8   :  { %s1835_s0 = scalar_lea.vmem %s86_s20, 16  ;;  %s1839_s24 = scalar_lea.vmem %s86_s20, 32 }
  0xe9   :  { %p1836_p7 = scmp.ne.s32.totalorder %s86_s20, %s1835_s0  ;;  %p1840_p8 = scmp.lt.s32.totalorder %s86_s20, %s86_s20 }
  0xea   :  { %p1841_p9 = scmp.lt.s32.totalorder %s1839_s24, %s1835_s0 }
  0xec   :  { %p1842_p10 = por %p1841_p9, %p1840_p8 }
  0xee   :  { %p1843_p11 = pnand %p1842_p10, %p1836_p7 }
  0xf0   :  { %1846 = shalt.err (!%p1843_p11)
}
  0xf1   :  { %88 = dma.hbm_to_vmem [thread:$0]  %s2538_s4, 16, %s86_s20, [#allocation9]  }
  0xf2   :  { %s1847_s2 = scalar_lea.hbm %s2540_s6, 256 }
  0xf3   :  { %p1848_p12 = scmp.ne.s32.totalorder %s2540_s6, %s1847_s2  ;;  %p1851_p13 = scmp.lt.u32.totalorder %s1847_s2, %s2540_s6 }
  0xf5   :  { %p1853_p0 = pnand %p1851_p13, %p1848_p12 }
  0xf7   :  { %1856 = shalt.err (!%p1853_p0)
}
  0xf8   :  { %s1857_s3 = scalar_lea.vmem %s105_s17, 256  ;;  %p1862_p2 = scmp.lt.s32.totalorder %s105_s17, %s105_s17 }
  0xf9   :  { %p1858_p1 = scmp.ne.s32.totalorder %s105_s17, %s1857_s3  ;;  %p1863_p3 = scmp.lt.s32.totalorder %s1857_s3, %s1857_s3 }
  0xfb   :  { %p1864_p4 = por %p1863_p3, %p1862_p2 }
  0xfd   :  { %p1865_p5 = pnand %p1864_p4, %p1858_p1 }
  0xff   :  { %1868 = shalt.err (!%p1865_p5)
}
 0x100   :  { %110 = dma.hbm_to_vmem [thread:$0]  %s2540_s6, 256, %s105_s17, [#allocation12], %s2056_s27, %s2056_s27, %s2057_s5  }
 0x101   :  { %s2062_s1 = smov [#allocation16]   ;;  %s2063_s9 = smov [#allocation19]  }
 0x102   :  { %s127_s29 = sshll.u32 %s2062_s1, 4  ;;  %s146_s23 = sshll.u32 %s2063_s9, 4  ;;  %s128_s29 = int_to_ptr.vmem [resolvable:$true] %s127_s29  ;;  %s147_s23 = int_to_ptr.vmem [resolvable:$true] %s146_s23 }
 0x103   :  { %s1869_s0 = scalar_lea.hbm %s2542_s8, 16 }
 0x104   :  { %p1870_p6 = scmp.ne.s32.totalorder %s2542_s8, %s1869_s0  ;;  %p1873_p7 = scmp.lt.u32.totalorder %s1869_s0, %s2542_s8 }
 0x106   :  { %p1875_p8 = pnand %p1873_p7, %p1870_p6 }
 0x108   :  { %1878 = shalt.err (!%p1875_p8)
}
 0x109   :  { %s1879_s6 = scalar_lea.vmem %s128_s29, 16  ;;  %s1883_s17 = scalar_lea.vmem %s128_s29, 32 }
 0x10a   :  { %p1880_p9 = scmp.ne.s32.totalorder %s128_s29, %s1879_s6  ;;  %p1884_p10 = scmp.lt.s32.totalorder %s128_s29, %s128_s29 }
 0x10b   :  { %p1885_p11 = scmp.lt.s32.totalorder %s1883_s17, %s1879_s6 }
 0x10d   :  { %p1886_p12 = por %p1885_p11, %p1884_p10 }
 0x10f   :  { %p1887_p13 = pnand %p1886_p12, %p1880_p9 }
 0x111   :  { %1890 = shalt.err (!%p1887_p13)
}
 0x112   :  { %130 = dma.hbm_to_vmem [thread:$0]  %s2542_s8, 16, %s128_s29, [#allocation15]  }
 0x113   :  { %s1891_s11 = scalar_lea.hbm %s2544_s10, 512 }
 0x114   :  { %p1892_p0 = scmp.ne.s32.totalorder %s2544_s10, %s1891_s11  ;;  %p1895_p1 = scmp.lt.u32.totalorder %s1891_s11, %s2544_s10 }
 0x116   :  { %p1897_p2 = pnand %p1895_p1, %p1892_p0 }
 0x118   :  { %1900 = shalt.err (!%p1897_p2)
}
 0x119   :  { %s1901_s1 = scalar_lea.vmem %s147_s23, 512  ;;  %p1906_p4 = scmp.lt.s32.totalorder %s147_s23, %s147_s23 }
 0x11a   :  { %p1902_p3 = scmp.ne.s32.totalorder %s147_s23, %s1901_s1  ;;  %p1907_p5 = scmp.lt.s32.totalorder %s1901_s1, %s1901_s1 }
 0x11c   :  { %p1908_p6 = por %p1907_p5, %p1906_p4 }
 0x11e   :  { %p1909_p7 = pnand %p1908_p6, %p1902_p3 }
 0x120   :  { %1912 = shalt.err (!%p1909_p7)
}
 0x121   :  { %152 = dma.hbm_to_vmem [thread:$0]  %s2544_s10, 512, %s147_s23, [#allocation18], %s2056_s27, %s2056_s27, %s2057_s5  }
 0x122   :  { %s2064_s9 = smov [#allocation22]   ;;  %s2065_s26 = smov [#allocation25]  }
 0x123   :  { %s169_s15 = sshll.u32 %s2064_s9, 4  ;;  %s189_s0 = sshll.u32 %s2065_s26, 4  ;;  %s170_s15 = int_to_ptr.vmem [resolvable:$true] %s169_s15  ;;  %s190_s0 = int_to_ptr.vmem [resolvable:$true] %s189_s0 }
 0x124   :  { %s1913_s30 = scalar_lea.hbm %s2546_s12, 16 }
 0x125   :  { %p1914_p8 = scmp.ne.s32.totalorder %s2546_s12, %s1913_s30  ;;  %p1917_p9 = scmp.lt.u32.totalorder %s1913_s30, %s2546_s12 }
 0x127   :  { %p1919_p10 = pnand %p1917_p9, %p1914_p8 }
 0x129   :  { %1922 = shalt.err (!%p1919_p10)
}
 0x12a   :  { %s1923_s10 = scalar_lea.vmem %s170_s15, 16  ;;  %s1927_s27 = scalar_lea.vmem %s170_s15, 32 }
 0x12b   :  { %p1924_p11 = scmp.ne.s32.totalorder %s170_s15, %s1923_s10  ;;  %p1928_p12 = scmp.lt.s32.totalorder %s170_s15, %s170_s15 }
 0x12c   :  { %p1929_p13 = scmp.lt.s32.totalorder %s1927_s27, %s1923_s10 }
 0x12e   :  { %p1930_p0 = por %p1929_p13, %p1928_p12 }
 0x130   :  { %p1931_p1 = pnand %p1930_p0, %p1924_p11 }
 0x132   :  { %1934 = shalt.err (!%p1931_p1)
}
 0x133   :  { %172 = dma.hbm_to_vmem [thread:$0]  %s2546_s12, 16, %s170_s15, [#allocation21]  }
 0x134   :  { %s1935_s22 = scalar_lea.hbm %s2548_s14, 16 }
 0x135   :  { %p1936_p2 = scmp.ne.s32.totalorder %s2548_s14, %s1935_s22  ;;  %p1939_p3 = scmp.lt.u32.totalorder %s1935_s22, %s2548_s14 }
 0x137   :  { %p1941_p4 = pnand %p1939_p3, %p1936_p2 }
 0x139   :  { %1944 = shalt.err (!%p1941_p4)
}
 0x13a   :  { %s1945_s20 = scalar_lea.vmem %s190_s0, 16  ;;  %s1949_s1 = scalar_lea.vmem %s190_s0, 32 }
 0x13b   :  { %p1946_p5 = scmp.ne.s32.totalorder %s190_s0, %s1945_s20  ;;  %p1950_p6 = scmp.lt.s32.totalorder %s190_s0, %s190_s0 }
 0x13c   :  { %p1951_p7 = scmp.lt.s32.totalorder %s1949_s1, %s1945_s20 }
 0x13e   :  { %p1952_p8 = por %p1951_p7, %p1950_p6 }
 0x140   :  { %p1953_p9 = pnand %p1952_p8, %p1946_p5 }
 0x142   :  { %1956 = shalt.err (!%p1953_p9)
}
 0x143   :  { %192 = dma.hbm_to_vmem [thread:$0]  %s2548_s14, 16, %s190_s0, [#allocation24]  }
 0x144   :  { %s2066_s29 = smov [#allocation28]   ;;  %s2067_s15 = smov [#allocation31]  }
 0x145   :  { %s211_s9 = sshll.u32 %s2066_s29, 4  ;;  %s233_s26 = sshll.u32 %s2067_s15, 4  ;;  %s212_s9 = int_to_ptr.vmem [resolvable:$true] %s211_s9  ;;  %s234_s26 = int_to_ptr.vmem [resolvable:$true] %s233_s26 }
 0x146   :  { %s1957_s30 = scalar_lea.hbm %s2550_s16, 16 }
 0x147   :  { %p1958_p10 = scmp.ne.s32.totalorder %s2550_s16, %s1957_s30  ;;  %p1961_p11 = scmp.lt.u32.totalorder %s1957_s30, %s2550_s16 }
 0x149   :  { %p1963_p12 = pnand %p1961_p11, %p1958_p10 }
 0x14b   :  { %1966 = shalt.err (!%p1963_p12)
}
 0x14c   :  { %s1967_s14 = scalar_lea.vmem %s212_s9, 16  ;;  %s1971_s0 = scalar_lea.vmem %s212_s9, 32 }
 0x14d   :  { %p1968_p13 = scmp.ne.s32.totalorder %s212_s9, %s1967_s14  ;;  %p1972_p0 = scmp.lt.s32.totalorder %s212_s9, %s212_s9 }
 0x14e   :  { %p1973_p1 = scmp.lt.s32.totalorder %s1971_s0, %s1967_s14 }
 0x150   :  { %p1974_p2 = por %p1973_p1, %p1972_p0 }
 0x152   :  { %p1975_p3 = pnand %p1974_p2, %p1968_p13 }
 0x154   :  { %1978 = shalt.err (!%p1975_p3)
}
 0x155   :  { %214 = dma.hbm_to_vmem [thread:$0]  %s2550_s16, 16, %s212_s9, [#allocation27]  }
 0x156   :  { %s1979_s2 = scalar_lea.hbm %s2552_s18, 16 }
 0x157   :  { %p1980_p4 = scmp.ne.s32.totalorder %s2552_s18, %s1979_s2  ;;  %p1983_p5 = scmp.lt.u32.totalorder %s1979_s2, %s2552_s18 }
 0x159   :  { %p1985_p6 = pnand %p1983_p5, %p1980_p4 }
 0x15b   :  { %1988 = shalt.err (!%p1985_p6)
}
 0x15c   :  { %s1989_s3 = scalar_lea.vmem %s234_s26, 16  ;;  %s1993_s4 = scalar_lea.vmem %s234_s26, 32 }
 0x15d   :  { %p1990_p7 = scmp.ne.s32.totalorder %s234_s26, %s1989_s3  ;;  %p1994_p8 = scmp.lt.s32.totalorder %s234_s26, %s234_s26 }
 0x15e   :  { %p1995_p9 = scmp.lt.s32.totalorder %s1993_s4, %s1989_s3 }
 0x160   :  { %p1996_p10 = por %p1995_p9, %p1994_p8 }
 0x162   :  { %p1997_p11 = pnand %p1996_p10, %p1990_p7 }
 0x164   :  { %2000 = shalt.err (!%p1997_p11)
}
 0x165   :  { %236 = dma.hbm_to_vmem [thread:$0]  %s2552_s18, 16, %s234_s26, [#allocation30]  }
 0x166   :  { %2023 = dma.done.wait [#allocation3], 256  }
 0x167   :  { %2024 = vsyncadd [#allocation3], 4294967040 }
 0x168   :  { %2025 = dma.done.wait [#allocation6], 320  }
 0x169   :  { %2026 = vsyncadd [#allocation6], 4294966976 }
 0x16a   :  { %2027 = dma.done.wait [#allocation9], 32  }
 0x16b   :  { %2028 = vsyncadd [#allocation9], 4294967264 }
 0x16c   :  { %2029 = dma.done.wait [#allocation12], 272  }
 0x16d   :  { %2030 = vsyncadd [#allocation12], 4294967024 }
 0x16e   :  { %2031 = dma.done.wait [#allocation15], 32  }
 0x16f   :  { %2032 = vsyncadd [#allocation15], 4294967264 }
 0x170   :  { %2033 = dma.done.wait [#allocation18], 528  }
 0x171   :  { %2034 = vsyncadd [#allocation18], 4294966768 }
 0x172   :  { %2035 = dma.done.wait [#allocation21], 32  }
 0x173   :  { %2036 = vsyncadd [#allocation21], 4294967264 }
 0x174   :  { %2037 = dma.done.wait [#allocation24], 32  }
 0x175   :  { %2038 = vsyncadd [#allocation24], 4294967264 }
 0x176   :  { %2039 = dma.done.wait [#allocation27], 1040  }
 0x177   :  { %2040 = vsyncadd [#allocation27], 4294966256 }
 0x178   :  { %2041 = dma.done.wait [#allocation30], 272  }
 0x179   :  { %2042 = vsyncadd [#allocation30], 4294967024  ;;  %v2068_v0 = vmov 0.0   ;;  %vm2069_vm0 = vmmov 0   ;;  %vm309_vm1 = vcmask 1043456   ;;  %v301_v2 = vld [vmem:[#allocation2] sm:$0xff]  ;;  %v450_v18 = vlaneseq }
 0x17a   :  { %1401 = vmatprep.subr.bf16.mxu1 %v2068_v0  ;;  %1403 = vmatprep.mubr.msk.bf16.mxu1 %vm2069_vm0, %v2068_v0  ;;  %v304_v1 = vld [vmem:[#allocation7] sm:$0xf]  ;;  %v302_v3 = vld [vmem:[#allocation2 + $0x8] sm:$0xff]  ;;  %vm305_vm2 = vcmask 64512   ;;  %v2070_v6 = vmov 0.0|0.0   ;;  %vm364_vm3 = vcmask 261120  }
 0x17b   :  { %1432 = vmatprep.mubr.msk.f32.mxu0 %vm2069_vm0, %v2068_v0  ;;  %v311_v4 = vsel %vm309_vm1, %v304_v1, 0  ;;  %v303_v5 = vpack.c.bf16 %v302_v3, %v301_v2  ;;  %1504 = vmatprep.subr.bf16.mxu0 %v2070_v6  ;;  %v1325_v7 = vld [vmem:[#allocation10] ss:$0 sm:$0xff]  ;;  %vm1502_vm4 = vmpackc.low %vm364_vm3, %vm364_vm3  ;;  %v354_v17 = vld [vmem:[#allocation8] sm:$0x1]  ;;  %v451_v19 = vshrl.u32 %v450_v18, 7 }
 0x17c   :  { %1402 = vmatpush3.bf16.msra.mxu1 %v311_v4  ;;  %v295_v22 = vld [vmem:[#allocation5] sm:$0xff]  ;;  %v296_v26 = vld [vmem:[#allocation5 + $0x8] sm:$0xff]  ;;  %v2071_v30 = vmov -1e+09   ;;  %vm464_vm9 = vcmask 130048   ;;  %vm617_vm10 = vcmask 523264  }
 0x17d   :  { %1500 = vmatprep.subr.bf16.mxu1 %v2070_v6  ;;  %v2445_v21 = vsub.s32 0, %v451_v19  ;;  %vm297_vm5 = vcmp.gt.f32.partialorder %v295_v22, 0.0  ;;  %vm298_vm6 = vcmp.gt.f32.partialorder %v296_v26, 0.0  ;;  %v1539_v52 = vld [vmem:[#allocation13] sm:$0xff]   ;;  %v1540_v53 = vld [vmem:[#allocation13 + $0x8] sm:$0xff]   ;;  %vm1506_vm11 = vmpackc.low %vm617_vm10, %vm617_vm10  ;;  %s2072_s18 = smov [#allocation32]  }
 0x17e   :  { %v2448_v31 = vsel %vm297_vm5, 0.0, %v2071_v30  ;;  %v2450_v35 = vsel %vm298_vm6, 0.0, %v2071_v30  ;;  %v1330_v60 = vld [vmem:[#allocation11] ss:$0 sm:$0xff]  ;;  %s1306_s1 = sshll.u32 %s2072_s18, 4  ;;  %s1307_s1 = int_to_ptr.vmem [resolvable:$true] %s1306_s1 }
 0x17f   :  { %1404 = vmatmul.mubr.msk.bf16.vlgmr.msra.gmra.mrb[0].mxu1 %vm305_vm2, %v303_v5  ;;  %s2001_s12 = scalar_lea.vmem %s1307_s1, 32  ;;  %p2006_p13 = scmp.lt.s32.totalorder %s1307_s1, %s1307_s1 }
 0x180   :  { %1411 = vmatprep.mubr.msk.f32.mxu1 %vm2069_vm0, %v2068_v0  ;;  %p2002_p12 = scmp.ne.s32.totalorder %s1307_s1, %s2001_s12  ;;  %p2007_p0 = scmp.lt.s32.totalorder %s2001_s12, %s2001_s12 }
 0x182   :  { %p2008_p1 = por %p2007_p0, %p2006_p13 }
 0x184   :  { %p2009_p2 = pnand %p2008_p1, %p2002_p12 }
 0x252   :  { %v347_v8 = vpop.f32.mrb[0].mxu1 }
 0x253   :  { %v1405_v9 = vpop.f32.mrb[1].mxu1  ;;  %v362_v10 = vmul.f32 %v1325_v7, %v347_v8 }
 0x254   :  { %v350_v11 = vpop.f32.mrb[2].mxu1 }
 0x255   :  { %v363_v12 = vmul.f32 %v1325_v7, %v350_v11  ;;  %v1501_v13 = vpack.c.bf16 %v350_v11, %v347_v8  ;;  %v1406_v14 = vpop.f32.mrb[3].mxu1  ;;  %v365_v15 = vsel %vm364_vm3, %v362_v10, 0.0  ;;  %v1334_v10 = vld [vmem:[#allocation16] ss:$0 sm:$0xff] }
 0x256   :  { %366 = vadd.xlane.f32.xlu0 %v365_v15 }
 0x257   :  { %1503 = vmatpush3.bf16.xpose.msk.msra.mxu1 %vm1502_vm4, %v1501_v13  ;;  %v368_v16 = vsel %vm364_vm3, %v363_v12, 0.0 }
 0x258   :  { %1414 = vmatprep.subr.bf16.mxu1 %v2068_v0 }
 0x25a   :  { %369 = vadd.xlane.f32.xlu0 %v368_v16 }
 0x25e   :  { %1412 = vmatmul.mubr.msk.f32.vlgmr.msra.gmra.mrb[4].mxu1 %vm364_vm3, %v354_v17 }
 0x25f   :  { %1415 = vmatpush3.bf16.msra.mxu1 %v1501_v13  ;;  %1416 = vmatprep.mubr.msk.bf16.mxu1 %vm2069_vm0, %v2068_v0 }
 0x260   :  { %1420 = vmatprep.subr.bf16.mxu1 %v2068_v0 }
 0x2e3   :  { %v367_v20 = vpop.xlane.xlu0 %366 }
 0x2e7   :  { %v370_v27 = vpop.xlane.xlu0 %369 }
 0x331   :  { %v446_v23 = vpop.f32.mrb[4].mxu1 }
 0x332   :  { %v453_v24 = vrot.slane %v446_v23, %v2445_v21  ;;  %v1413_v25 = vpop.f32.mrb[5].mxu1 }
 0x334   :  { %v454_v28 = vadd.f32 %v453_v24, %v367_v20  ;;  %v455_v29 = vadd.f32 %v453_v24, %v370_v27  ;;  %v607_v20 = vld [vmem:[#allocation14] sm:$0x1] }
 0x336   :  { %v458_v32 = vmul.f32 0.2, %v454_v28  ;;  %v459_v33 = vmul.f32 0.2, %v455_v29  ;;  %vm456_vm7 = vcmp.gt.f32.partialorder %v454_v28, 0.0  ;;  %vm457_vm8 = vcmp.gt.f32.partialorder %v455_v29, 0.0 }
 0x338   :  { %v460_v34 = vsel %vm456_vm7, %v454_v28, %v458_v32  ;;  %v461_v36 = vsel %vm457_vm8, %v455_v29, %v459_v33 }
 0x339   :  { %v462_v37 = vadd.f32 %v460_v34, %v2448_v31  ;;  %v463_v39 = vadd.f32 %v461_v36, %v2450_v35 }
 0x33b   :  { %v465_v38 = vsel %vm464_vm9, %v462_v37, -inf  ;;  %v468_v40 = vsel %vm464_vm9, %v463_v39, -inf }
 0x33c   :  { %466 = vmax.xlane.f32.xlu1 %v465_v38 }
 0x340   :  { %469 = vmax.xlane.f32.xlu1 %v468_v40 }
 0x3c9   :  { %v467_v41 = vpop.xlane.xlu1 %466 }
 0x3ca   :  { %v471_v42 = vsub.f32 %v462_v37, %v467_v41 }
 0x3cc   :  { %v473_v43 = vmul.f32 1.442695, %v471_v42 }
 0x3cd   :  { %v470_v44 = vpop.xlane.xlu1 %469 }
 0x3ce   :  { %1555 = vpow2.f32 %v473_v43  ;;  %v472_v45 = vsub.f32 %v463_v39, %v470_v44 }
 0x3d0   :  { %v475_v46 = vmul.f32 1.442695, %v472_v45 }
 0x3d2   :  { %1557 = vpow2.f32 %v475_v46 }
 0x3d8   :  { %v1556_v47 = vpop.eup %1555 }
 0x3d9   :  { %v477_v48 = vsel %vm464_vm9, %v1556_v47, 0.0 }
 0x3da   :  { %478 = vadd.xlane.f32.xlu0 %v477_v48 }
 0x3dc   :  { %v1558_v49 = vpop.eup %1557 }
 0x3dd   :  { %v480_v50 = vsel %vm464_vm9, %v1558_v49, 0.0  ;;  %v485_v51 = vpack.c.bf16 %v1558_v49, %v1556_v47  ;;  %v1541_v49 = vld [vmem:[#allocation19] sm:$0xff]  }
 0x3de   :  { %481 = vadd.xlane.f32.xlu1 %v480_v50  ;;  %v1542_v50 = vld [vmem:[#allocation19 + $0x8] sm:$0xff]  }
 0x3df   :  { %1417 = vmatmul.mubr.msk.bf16.vlgmr.msra.gmra.mrb[8].mxu1 %vm464_vm9, %v485_v51  ;;  %v1543_v51 = vld [vmem:[#allocation19 + $0x10] sm:$0xff]  }
 0x3e0   :  { %1424 = vmatprep.mubr.msk.bf16.mxu1 %vm2069_vm0, %v2068_v0  ;;  %1421 = vmatpush3.bf16.msra.mxu1 %v1539_v52  ;;  %v1544_v52 = vld [vmem:[#allocation19 + $0x18] sm:$0xff]  }
 0x3e1   :  { %1422 = vmatprep.subr.bf16.mxu1 %v2068_v0 }
 0x3e4   :  { %1423 = vmatpush3.bf16.msra.mxu1 %v1540_v53 }
 0x3e5   :  { %1441 = vmatprep.subr.bf16.mxu1 %v2068_v0 }
 0x467   :  { %v479_v54 = vpop.xlane.xlu0 %478 }
 0x468   :  { %v483_v56 = vmax.f32 %v479_v54, 1e-09 }
 0x46a   :  { %1559 = vrcp.f32 %v483_v56 }
 0x46b   :  { %v482_v55 = vpop.xlane.xlu1 %481 }
 0x46c   :  { %v484_v57 = vmax.f32 %v482_v55, 1e-09 }
 0x46e   :  { %1561 = vrcp.f32 %v484_v57 }
 0x474   :  { %v1560_v58 = vpop.eup %1559 }
 0x478   :  { %v1562_v63 = vpop.eup %1561 }
 0x4b2   :  { %v524_v59 = vpop.f32.mrb[8].mxu1 }
 0x4b3   :  { %v533_v61 = vmul.f32 %v1560_v58, %v524_v59  ;;  %v1418_v62 = vpop.f32.mrb[9].mxu1  ;;  %v1339_v59 = vld [vmem:[#allocation17] ss:$0 sm:$0xff] }
 0x4b4   :  { %v527_v1 = vpop.f32.mrb[10].mxu1 }
 0x4b5   :  { %v542_v2 = vadd.f32 %v1330_v60, %v533_v61  ;;  %v534_v3 = vmul.f32 %v1562_v63, %v527_v1  ;;  %v1419_v4 = vpop.f32.mrb[11].mxu1 }
 0x4b7   :  { %v543_v5 = vadd.f32 %v1330_v60, %v534_v3  ;;  %v544_v7 = vmax.f32 %v542_v2, 0.0 }
 0x4b9   :  { %v545_v8 = vmax.f32 %v543_v5, 0.0 }
 0x4bb   :  { %v546_v9 = vpack.c.bf16 %v545_v8, %v544_v7 }
 0x4bd   :  { %1425 = vmatmul.mubr.msk.bf16.vlgmr.msra.gmra.mrb[12].mxu1 %vm364_vm3, %v546_v9  ;;  %v1345_v9 = vld [vmem:[#allocation22] ss:$0 sm:$0xff] }
 0x4be   :  { %1449 = vmatprep.mubr.msk.bf16.mxu1 %vm2069_vm0, %v2068_v0  ;;  %1442 = vmatpush3.bf16.msra.mxu1 %v1541_v49  ;;  %v1551_v49 = vld [vmem:[#allocation26 + $0x30] sm:$0xff]  }
 0x4bf   :  { %1443 = vmatprep.subr.bf16.mxu1 %v2068_v0 }
 0x4c2   :  { %1444 = vmatpush3.bf16.msra.mxu1 %v1542_v50 }
 0x4c3   :  { %1445 = vmatprep.subr.bf16.mxu1 %v2068_v0 }
 0x4c6   :  { %1446 = vmatpush3.bf16.msra.mxu1 %v1543_v51 }
 0x4c7   :  { %1447 = vmatprep.subr.bf16.mxu1 %v2068_v0 }
 0x4ca   :  { %1448 = vmatpush3.bf16.msra.mxu1 %v1544_v52 }
 0x4cb   :  { %1466 = vmatprep.subr.bf16.mxu1 %v2068_v0 }
 0x590   :  { %v600_v11 = vpop.f32.mrb[12].mxu1 }
 0x591   :  { %v615_v12 = vmul.f32 %v1334_v10, %v600_v11  ;;  %v1426_v13 = vpop.f32.mrb[13].mxu1 }
 0x592   :  { %v603_v14 = vpop.f32.mrb[14].mxu1 }
 0x593   :  { %v616_v15 = vmul.f32 %v1334_v10, %v603_v14  ;;  %v1505_v16 = vpack.c.bf16 %v603_v14, %v600_v11  ;;  %v1427_v17 = vpop.f32.mrb[15].mxu1  ;;  %v618_v18 = vsel %vm617_vm10, %v615_v12, 0.0 }
 0x594   :  { %619 = vadd.xlane.f32.xlu0 %v618_v18  ;;  %v875_v17 = vld [vmem:[#allocation20] sm:$0x1] }
 0x595   :  { %1507 = vmatpush3.bf16.xpose.msk.msra.mxu0 %vm1506_vm11, %v1505_v16  ;;  %v621_v19 = vsel %vm617_vm10, %v616_v15, 0.0 }
 0x596   :  { %622 = vadd.xlane.f32.xlu1 %v621_v19  ;;  %1435 = vmatprep.subr.bf16.mxu0 %v2068_v0 }
 0x59c   :  { %1433 = vmatmul.mubr.msk.f32.vlgmr.msra.gmra.mrb[0].mxu0 %vm617_vm10, %v607_v20 }
 0x59d   :  { %1436 = vmatpush3.bf16.msra.mxu0 %v1505_v16  ;;  %1437 = vmatprep.mubr.msk.bf16.mxu0 %vm2069_vm0, %v2068_v0 }
 0x59e   :  { %1508 = vmatprep.subr.bf16.mxu0 %v2070_v6 }
 0x621   :  { %v620_v25 = vpop.xlane.xlu0 %619 }
 0x623   :  { %v623_v26 = vpop.xlane.xlu1 %622 }
 0x66f   :  { %v699_v22 = vpop.f32.mrb[0].mxu0 }
 0x670   :  { %v706_v23 = vrot.slane %v699_v22, %v2445_v21  ;;  %v1434_v24 = vpop.f32.mrb[1].mxu0 }
 0x672   :  { %v707_v27 = vadd.f32 %v706_v23, %v620_v25  ;;  %v708_v28 = vadd.f32 %v706_v23, %v623_v26 }
 0x674   :  { %v711_v29 = vmul.f32 0.2, %v707_v27  ;;  %v712_v30 = vmul.f32 0.2, %v708_v28  ;;  %vm709_vm12 = vcmp.gt.f32.partialorder %v707_v27, 0.0  ;;  %vm710_vm13 = vcmp.gt.f32.partialorder %v708_v28, 0.0 }
 0x676   :  { %v713_v32 = vsel %vm709_vm12, %v707_v27, %v711_v29  ;;  %v714_v33 = vsel %vm710_vm13, %v708_v28, %v712_v30 }
 0x677   :  { %v715_v34 = vadd.f32 %v713_v32, %v2448_v31  ;;  %v716_v36 = vadd.f32 %v714_v33, %v2450_v35 }
 0x679   :  { %v717_v6 = vsel %vm464_vm9, %v715_v34, -inf  ;;  %v720_v37 = vsel %vm464_vm9, %v716_v36, -inf }
 0x67a   :  { %718 = vmax.xlane.f32.xlu0 %v717_v6  ;;  %721 = vmax.xlane.f32.xlu1 %v720_v37 }
 0x707   :  { %v719_v38 = vpop.xlane.xlu0 %718  ;;  %v722_v39 = vpop.xlane.xlu1 %721 }
 0x708   :  { %v723_v40 = vsub.f32 %v715_v34, %v719_v38  ;;  %v724_v41 = vsub.f32 %v716_v36, %v722_v39 }
 0x70a   :  { %v725_v42 = vmul.f32 1.442695, %v723_v40  ;;  %v727_v43 = vmul.f32 1.442695, %v724_v41 }
 0x70c   :  { %1563 = vpow2.f32 %v725_v42 }
 0x70d   :  { %1565 = vpow2.f32 %v727_v43  ;;  %v1545_v43 = vld [vmem:[#allocation26] sm:$0xff]  }
 0x716   :  { %v1564_v44 = vpop.eup %1563 }
 0x717   :  { %v1566_v45 = vpop.eup %1565  ;;  %v729_v46 = vsel %vm464_vm9, %v1564_v44, 0.0 }
 0x718   :  { %730 = vadd.xlane.f32.xlu0 %v729_v46  ;;  %v732_v47 = vsel %vm464_vm9, %v1566_v45, 0.0  ;;  %v737_v48 = vpack.c.bf16 %v1566_v45, %v1564_v44  ;;  %v1546_v44 = vld [vmem:[#allocation26 + $0x8] sm:$0xff]   ;;  %v1547_v45 = vld [vmem:[#allocation26 + $0x10] sm:$0xff]   ;;  %v1548_v46 = vld [vmem:[#allocation26 + $0x18] sm:$0xff]  }
 0x719   :  { %733 = vadd.xlane.f32.xlu1 %v732_v47  ;;  %v1549_v47 = vld [vmem:[#allocation26 + $0x20] sm:$0xff]  }
 0x71a   :  { %1438 = vmatmul.mubr.msk.bf16.vlgmr.msra.gmra.mrb[4].mxu0 %vm464_vm9, %v737_v48  ;;  %v1550_v48 = vld [vmem:[#allocation26 + $0x28] sm:$0xff]  }
 0x71b   :  { %1457 = vmatprep.mubr.msk.f32.mxu0 %vm2069_vm0, %v2068_v0 }
 0x7a5   :  { %v731_v53 = vpop.xlane.xlu0 %730 }
 0x7a6   :  { %v734_v54 = vpop.xlane.xlu1 %733  ;;  %v735_v55 = vmax.f32 %v731_v53, 1e-09 }
 0x7a7   :  { %v736_v56 = vmax.f32 %v734_v54, 1e-09 }
 0x7a8   :  { %1567 = vrcp.f32 %v735_v55 }
 0x7a9   :  { %1569 = vrcp.f32 %v736_v56 }
 0x7b2   :  { %v1568_v57 = vpop.eup %1567 }
 0x7b3   :  { %v1570_v62 = vpop.eup %1569 }
 0x7ed   :  { %v776_v58 = vpop.f32.mrb[4].mxu0 }
 0x7ee   :  { %v785_v60 = vmul.f32 %v1568_v57, %v776_v58  ;;  %v1439_v61 = vpop.f32.mrb[5].mxu0 }
 0x7ef   :  { %v779_v63 = vpop.f32.mrb[6].mxu0 }
 0x7f0   :  { %v794_v1 = vadd.f32 %v1339_v59, %v785_v60  ;;  %v786_v2 = vmul.f32 %v1570_v62, %v779_v63  ;;  %v1440_v3 = vpop.f32.mrb[7].mxu0 }
 0x7f1   :  { %v1052_v3 = vld [vmem:[#allocation25] sm:$0x1] }
 0x7f2   :  { %v795_v4 = vadd.f32 %v1339_v59, %v786_v2  ;;  %v796_v5 = vmax.f32 %v794_v1, 0.0  ;;  %v1347_v59 = vld [vmem:[#allocation23] ss:$0 sm:$0xff] }
 0x7f4   :  { %v797_v7 = vmax.f32 %v795_v4, 0.0  ;;  %v1552_v4 = vld [vmem:[#allocation26 + $0x38] sm:$0xff]  }
 0x7f6   :  { %v798_v8 = vpack.c.bf16 %v797_v7, %v796_v5 }
 0x7f8   :  { %1450 = vmatmul.mubr.msk.bf16.vlgmr.msra.gmra.mrb[16].mxu1 %vm617_vm10, %v798_v8 }
 0x7f9   :  { %1468 = vmatprep.mubr.msk.bf16.mxu1 %vm2069_vm0, %v2068_v0 }
 0x8cb   :  { %v868_v10 = vpop.f32.mrb[16].mxu1 }
 0x8cc   :  { %v1451_v11 = vpop.f32.mrb[17].mxu1  ;;  %v883_v12 = vmul.f32 %v1345_v9, %v868_v10 }
 0x8cd   :  { %v871_v13 = vpop.f32.mrb[18].mxu1  ;;  %v1553_v11 = vld [vmem:[#allocation29] sm:$0xff]  }
 0x8ce   :  { %v1509_v14 = vpack.c.bf16 %v871_v13, %v868_v10  ;;  %885 = vadd.xlane.f32.xlu0 %v883_v12  ;;  %v1452_v15 = vpop.f32.mrb[19].mxu1  ;;  %v884_v16 = vmul.f32 %v1345_v9, %v871_v13  ;;  %v1554_v12 = vld [vmem:[#allocation29 + $0x8] sm:$0xff]   ;;  %v1349_v13 = vld [vmem:[#allocation28] ss:$0 sm:$0xff] }
 0x8d0   :  { %1510 = vmatpush3.bf16.xpose.msra.mxu0 %v1509_v14  ;;  %887 = vadd.xlane.f32.xlu1 %v884_v16 }
 0x8d1   :  { %1460 = vmatprep.subr.bf16.mxu0 %v2068_v0 }
 0x8d7   :  { %1458 = vmatmul.mubr.f32.vlgmr.msra.gmra.mrb[2].mxu0 %v875_v17 }
 0x8d8   :  { %1461 = vmatpush3.bf16.msra.mxu0 %v1509_v14  ;;  %1462 = vmatprep.mubr.msk.bf16.mxu0 %vm2069_vm0, %v2068_v0 }
 0x8d9   :  { %1472 = vmatprep.subr.bf16.mxu0 %v2068_v0 }
 0x95b   :  { %v886_v22 = vpop.xlane.xlu0 %885 }
 0x95d   :  { %v888_v23 = vpop.xlane.xlu1 %887 }
 0x9aa   :  { %v955_v18 = vpop.f32.mrb[2].mxu0 }
 0x9ab   :  { %v962_v19 = vrot.slane %v955_v18, %v2445_v21  ;;  %v1459_v20 = vpop.f32.mrb[3].mxu0 }
 0x9ad   :  { %v963_v24 = vadd.f32 %v962_v19, %v886_v22  ;;  %v964_v25 = vadd.f32 %v962_v19, %v888_v23  ;;  %v1358_v22 = vld [vmem:[#allocation31] ss:$0 sm:$0xff] }
 0x9af   :  { %v967_v26 = vmul.f32 0.2, %v963_v24  ;;  %v968_v27 = vmul.f32 0.2, %v964_v25  ;;  %vm965_vm14 = vcmp.gt.f32.partialorder %v963_v24, 0.0  ;;  %vm966_vm15 = vcmp.gt.f32.partialorder %v964_v25, 0.0 }
 0x9b1   :  { %v969_v28 = vsel %vm965_vm14, %v963_v24, %v967_v26  ;;  %v970_v29 = vsel %vm966_vm15, %v964_v25, %v968_v27 }
 0x9b2   :  { %v971_v30 = vadd.f32 %v969_v28, %v2448_v31  ;;  %v972_v32 = vadd.f32 %v970_v29, %v2450_v35 }
 0x9b4   :  { %v973_v33 = vsel %vm464_vm9, %v971_v30, -inf  ;;  %v976_v34 = vsel %vm464_vm9, %v972_v32, -inf }
 0x9b5   :  { %974 = vmax.xlane.f32.xlu0 %v973_v33  ;;  %977 = vmax.xlane.f32.xlu1 %v976_v34 }
 0xa42   :  { %v975_v21 = vpop.xlane.xlu0 %974  ;;  %v978_v36 = vpop.xlane.xlu1 %977 }
 0xa43   :  { %v979_v6 = vsub.f32 %v971_v30, %v975_v21  ;;  %v980_v37 = vsub.f32 %v972_v32, %v978_v36 }
 0xa45   :  { %v981_v38 = vmul.f32 1.442695, %v979_v6  ;;  %v983_v39 = vmul.f32 1.442695, %v980_v37 }
 0xa47   :  { %1571 = vpow2.f32 %v981_v38 }
 0xa48   :  { %1573 = vpow2.f32 %v983_v39 }
 0xa51   :  { %v1572_v40 = vpop.eup %1571 }
 0xa52   :  { %v1574_v41 = vpop.eup %1573  ;;  %v985_v31 = vsel %vm464_vm9, %v1572_v40, 0.0 }
 0xa53   :  { %986 = vadd.xlane.f32.xlu0 %v985_v31  ;;  %v988_v35 = vsel %vm464_vm9, %v1574_v41, 0.0  ;;  %v993_v42 = vpack.c.bf16 %v1574_v41, %v1572_v40 }
 0xa54   :  { %989 = vadd.xlane.f32.xlu1 %v988_v35 }
 0xa55   :  { %1463 = vmatmul.mubr.msk.bf16.vlgmr.msra.gmra.mrb[8].mxu0 %vm464_vm9, %v993_v42 }
 0xa56   :  { %1488 = vmatprep.mubr.msk.bf16.mxu0 %vm2069_vm0, %v2068_v0  ;;  %1473 = vmatpush3.bf16.msra.mxu0 %v1545_v43 }
 0xa57   :  { %1474 = vmatprep.subr.bf16.mxu0 %v2068_v0 }
 0xa5a   :  { %1475 = vmatpush3.bf16.msra.mxu0 %v1546_v44 }
 0xa5b   :  { %1476 = vmatprep.subr.bf16.mxu0 %v2068_v0 }
 0xa5e   :  { %1477 = vmatpush3.bf16.msra.mxu0 %v1547_v45 }
 0xa5f   :  { %1478 = vmatprep.subr.bf16.mxu0 %v2068_v0 }
 0xa62   :  { %1479 = vmatpush3.bf16.msra.mxu0 %v1548_v46 }
 0xa63   :  { %1480 = vmatprep.subr.bf16.mxu0 %v2068_v0 }
 0xa66   :  { %1481 = vmatpush3.bf16.msra.mxu0 %v1549_v47 }
 0xa67   :  { %1482 = vmatprep.subr.bf16.mxu0 %v2068_v0 }
 0xa6a   :  { %1483 = vmatpush3.bf16.msra.mxu0 %v1550_v48 }
 0xa6b   :  { %1484 = vmatprep.subr.bf16.mxu0 %v2068_v0 }
 0xa6e   :  { %1485 = vmatpush3.bf16.msra.mxu0 %v1551_v49 }
 0xa6f   :  { %1486 = vmatprep.subr.bf16.mxu0 %v2068_v0 }
 0xa72   :  { %1487 = vmatpush3.bf16.msra.mxu0 %v1552_v4 }
 0xae0   :  { %v987_v50 = vpop.xlane.xlu0 %986 }
 0xae1   :  { %v990_v51 = vpop.xlane.xlu1 %989  ;;  %v991_v52 = vmax.f32 %v987_v50, 1e-09 }
 0xae2   :  { %v992_v53 = vmax.f32 %v990_v51, 1e-09 }
 0xae3   :  { %1575 = vrcp.f32 %v991_v52 }
 0xae4   :  { %1577 = vrcp.f32 %v992_v53 }
 0xaed   :  { %v1576_v54 = vpop.eup %1575 }
 0xaee   :  { %v1578_v58 = vpop.eup %1577 }
 0xb28   :  { %v1032_v55 = vpop.f32.mrb[8].mxu0 }
 0xb29   :  { %v1041_v56 = vmul.f32 %v1576_v54, %v1032_v55  ;;  %v1464_v57 = vpop.f32.mrb[9].mxu0 }
 0xb2a   :  { %v1035_v60 = vpop.f32.mrb[10].mxu0 }
 0xb2b   :  { %v1042_v61 = vmul.f32 %v1578_v58, %v1035_v60  ;;  %v1465_v62 = vpop.f32.mrb[11].mxu0  ;;  %v1050_v63 = vadd.f32 %v1347_v59, %v1041_v56 }
 0xb2d   :  { %v1051_v1 = vadd.f32 %v1347_v59, %v1042_v61 }
 0xb2f   :  { %v1053_v2 = vpack.c.bf16 %v1051_v1, %v1050_v63 }
 0xb31   :  { %1467 = vmatpush3.bf16.msra.mxu1 %v1053_v2 }
 0xb32   :  { %1492 = vmatprep.subr.bf16.mxu1 %v2068_v0 }
 0xb34   :  { %1469 = vmatmul.mubr.msk.bf16.vlgmr.msra.gmra.mrb[20].mxu1 %vm464_vm9, %v1052_v3 }
 0xb35   :  { %1496 = vmatprep.mubr.msk.bf16.mxu1 %vm2069_vm0, %v2068_v0  ;;  %1493 = vmatpush3.bf16.msra.mxu1 %v1553_v11  ;;  %vm1277_vm0 = vcmask 25600  }
 0xb36   :  { %1494 = vmatprep.subr.bf16.mxu1 %v2068_v0 }
 0xb39   :  { %1495 = vmatpush3.bf16.msra.mxu1 %v1554_v12 }
 0xc07   :  { %v1091_v5 = vpop.f32.mrb[20].mxu1 }
 0xc08   :  { %v1097_v7 = vpack.c.bf16 %v1091_v5, %v1091_v5  ;;  %v1470_v8 = vpop.f32.mrb[21].mxu1 }
 0xc09   :  { %v1094_v9 = vpop.f32.mrb[22].mxu1 }
 0xc0a   :  { %1489 = vmatmul.mubr.bf16.vlgmr.msra.gmra.mrb[12].mxu0 %v1097_v7  ;;  %v1471_v10 = vpop.f32.mrb[23].mxu1 }
 0xcdd   :  { %v1203_v14 = vpop.f32.mrb[12].mxu0 }
 0xcde   :  { %v1204_v15 = vadd.f32 %v1349_v13, %v1203_v14  ;;  %v1490_v16 = vpop.f32.mrb[13].mxu0 }
 0xcdf   :  { %v1206_v17 = vpop.f32.mrb[14].mxu0 }
 0xce0   :  { %v1209_v18 = vmax.f32 %v1204_v15, 0.0  ;;  %v1491_v19 = vpop.f32.mrb[15].mxu0 }
 0xce2   :  { %v1210_v20 = vpack.c.bf16 %v1209_v18, %v1209_v18 }
 0xce4   :  { %1497 = vmatmul.mubr.msk.bf16.vlgmr.msra.gmra.mrb[24].mxu1 %vm364_vm3, %v1210_v20 }
 0xdb7   :  { %v1271_v23 = vpop.f32.mrb[24].mxu1 }
 0xdb8   :  { %v1272_v24 = vadd.f32 %v1358_v22, %v1271_v23  ;;  %v1498_v25 = vpop.f32.mrb[25].mxu1 }
 0xdb9   :  { %v1274_v26 = vpop.f32.mrb[26].mxu1 }
 0xdba   :  { %v1499_v27 = vpop.f32.mrb[27].mxu1  ;;  %v1278_v0 = vsel %vm1277_vm0, %v1272_v24, -inf }
 0xdbb   :  { %v1279_v28 = vrot.slane %v1278_v0, 4 }
 0xdbd   :  { %v1280_v29 = vmax.f32 %v1278_v0, %v1279_v28 }
 0xdbf   :  { %v1281_v30 = vrot.slane %v1280_v29, 2 }
 0xdc1   :  { %v1282_v32 = vmax.f32 %v1280_v29, %v1281_v30 }
 0xdc3   :  { %v1283_v33 = vrot.slane %v1282_v32, 1 }
 0xdc5   :  { %v1284_v34 = vmax.f32 %v1282_v32, %v1283_v33 }
 0xdc7   :  { %v1285_v21 = vsub.f32 %v1272_v24, %v1284_v34 }
 0xdc9   :  { %v1286_v36 = vmul.f32 1.442695, %v1285_v21 }
 0xdcb   :  { %1579 = vpow2.f32 %v1286_v36 }
 0xdd5   :  { %v1580_v6 = vpop.eup %1579 }
 0xdd6   :  { %v1288_v37 = vsel %vm1277_vm0, %v1580_v6, 0.0 }
 0xdd7   :  { %v1289_v38 = vrot.slane %v1288_v37, 4 }
 0xdd9   :  { %v1290_v39 = vadd.f32 %v1289_v38, %v1288_v37 }
 0xddb   :  { %v1291_v40 = vrot.slane %v1290_v39, 2 }
 0xddd   :  { %v1292_v41 = vadd.f32 %v1291_v40, %v1290_v39 }
 0xddf   :  { %v1293_v31 = vrot.slane %v1292_v41, 1 }
 0xde1   :  { %v1294_v35 = vadd.f32 %v1293_v31, %v1292_v41 }
 0xde3   :  { %1581 = vlog2.f32 %v1294_v35 }
 0xded   :  { %v1582_v42 = vpop.eup %1581 }
 0xdee   :  { %v1296_v43 = vmul.f32 0.6931472, %v1582_v42 }
 0xdf0   :  { %v1297_v44 = vadd.f32 %v1296_v43, %v1284_v34 }
 0xdf2   :  { %v1298_v45 = vsub.f32 %v1272_v24, %v1297_v44 }
 0xdf4   :  { %1299 = vst.msk [vmem:[#allocation32] sm:$0x3] %vm1277_vm0, %v1298_v45 }
 0xdf5   :  { %2012 = shalt.err (!%p2009_p2)
}
 0xdf6   :  { %s2013_s9 = scalar_lea.hbm %s2553_s19, 32 }
 0xdf7   :  { %p2014_p3 = scmp.ne.s32.totalorder %s2553_s19, %s2013_s9  ;;  %p2017_p4 = scmp.lt.u32.totalorder %s2013_s9, %s2553_s19 }
 0xdf9   :  { %p2019_p5 = pnand %p2017_p4, %p2014_p3 }
 0xdfb   :  { %2022 = shalt.err (!%p2019_p5)
}
 0xdfc   :  { %1309 = dma.vmem_to_hbm [thread:$0]  %s1307_s1, 32, %s2553_s19, [#allocation4]  }
 0xdfd   :  { %2043 = dma.done.wait [#allocation4], 32  }
 0xdfe   :  { %2044 = vsyncadd [#allocation4], 4294967264 }
 0xdff   :  { %1313 = vsyncpa [#allocation3], 1 }
 0xe00   :  { %1314 = vsyncpa [#allocation6], 1 }
 0xe01   :  { %1315 = vsyncpa [#allocation9], 1 }
 0xe02   :  { %1316 = vsyncpa [#allocation12], 1 }
 0xe03   :  { %1317 = vsyncpa [#allocation15], 1 }
 0xe04   :  { %1318 = vsyncpa [#allocation18], 1 }
 0xe05   :  { %1319 = vsyncpa [#allocation21], 1 }
 0xe06   :  { %1320 = vsyncpa [#allocation24], 1 }
 0xe07   :  { %1321 = vsyncpa [#allocation27], 1 }
 0xe08   :  { %1322 = vsyncpa [#allocation30], 1 }
 0xe09   :  { %1323 = vsyncpa [#allocation4], 1 }

</bundles_post_ra>
